<compile_context>
chip_gen: v7x
topology: tpu7x:2x2x1
jax: 0.10.0
libtpu: 0.0.40
codegen_flags: <defaults>
</compile_context>

<pallas_src>
import functools

import jax
import jax.numpy as jnp
import numpy as np
from jax.experimental import pallas as pl
from jax.experimental.pallas import tpu as pltpu


# ----------------------------------------------------------------------------
# Single fused kernel: ALL layers, ALL heads, one grid step per batch element
# ----------------------------------------------------------------------------
def _fused_mhlce_kernel(*refs, num_layers, num_heads, nfc, out_pad):
    if num_layers > 1:
        (img_ref, roi_ref, wimgT_ref, wemb0_ref, wembR_ref,
         w1_ref, w2_ref, vecs_ref, avg_ref, out_ref) = refs
    else:
        (img_ref, roi_ref, wimgT_ref, wemb0_ref,
         w1_ref, w2_ref, vecs_ref, avg_ref, out_ref) = refs
        wembR_ref = None

    img = img_ref[0]          # (D, S)   raw image features, channels-FIRST
    x_in = roi_ref[0]         # (N, Din) layer-1 emb input (flattened roi)
    V = vecs_ref[...]         # (L, 8, F) packed bias / LayerNorm vectors
    avg = avg_ref[...]        # (F, F)   block-diag per-head averaging matrix

    for l in range(num_layers):                    # static unroll over layers
        bimg = V[l, 0:1, :]
        bemb = V[l, 1:2, :]
        b1 = V[l, 2:3, :]
        b2 = V[l, 3:4, :]
        g1 = V[l, 4:5, :]
        be1 = V[l, 5:6, :]
        g2 = V[l, 6:7, :]
        be2 = V[l, 7:8, :]

        # all-heads emb projection: single MXU call
        wemb = wemb0_ref[...] if l == 0 else wembR_ref[l - 1]
        emb = jnp.dot(x_in, wemb, preferred_element_type=jnp.float32) + bemb   # (N, F)

        # all-heads image projection, produced directly transposed (F, S).
        # Bias omitted here: it only shifts scores by a per-row constant
        # (softmax-invariant) and adds exactly bimg to ctx (attn rows sum to 1).
        pT = jnp.dot(wimgT_ref[l], img, preferred_element_type=jnp.float32)    # (F, S)
        p = jnp.transpose(pT)                       # one small transpose per layer (S, F)

        # attention per head (tiny matmuls, static unroll)
        ctx_parts = []
        for h in range(num_heads):
            sl = slice(h * nfc, (h + 1) * nfc)
            s = jnp.dot(emb[:, sl], pT[sl, :],
                        preferred_element_type=jnp.float32)                    # (N, S)
            s = s - jnp.max(s, axis=-1, keepdims=True)
            e = jnp.exp(s)
            a = e * pl.reciprocal(jnp.sum(e, axis=-1, keepdims=True), approx=False)
            ctx_parts.append(jnp.dot(a, p[:, sl],
                                     preferred_element_type=jnp.float32))      # (N, NFC)
        ctx = jnp.concatenate(ctx_parts, axis=-1) + bimg                        # (N, F)

        # residual + per-head LayerNorm1 (stats via block-diag averaging matmul)
        x = ctx + emb
        mu = jnp.dot(x, avg, preferred_element_type=jnp.float32)
        xc = x - mu
        var = jnp.dot(xc * xc, avg, preferred_element_type=jnp.float32)
        x = xc * jax.lax.rsqrt(var + 1e-5) * g1 + be1

        # block-diagonal all-head FFN + residual + per-head LayerNorm2
        h1 = jnp.maximum(
            jnp.dot(x, w1_ref[l], preferred_element_type=jnp.float32) + b1, 0.0)
        f = jnp.dot(h1, w2_ref[l], preferred_element_type=jnp.float32) + b2
        y = x + f
        mu2 = jnp.dot(y, avg, preferred_element_type=jnp.float32)
        yc = y - mu2
        var2 = jnp.dot(yc * yc, avg, preferred_element_type=jnp.float32)
        x_in = yc * jax.lax.rsqrt(var2 + 1e-5) * g2 + be2                       # (N, F)

    # single lane-dense store (padded to a 128-lane multiple -> unmasked vst)
    if out_pad:
        x_in = jnp.concatenate(
            [x_in, jnp.zeros((x_in.shape[0], out_pad), jnp.float32)], axis=-1)
    out_ref[0] = x_in


def fused_mhlce(img_cf, roi0, w, *, num_layers, H, N, NFC, out_w):
    """img_cf: (BT, D, S) channels-first, roi0: (BT, N, D*K*K) -> (BT, N, out_w)."""
    BT, D, S = img_cf.shape
    DKK = roi0.shape[-1]
    F = NFC * H
    L = num_layers

    kern = functools.partial(_fused_mhlce_kernel, num_layers=L, num_heads=H,
                             nfc=NFC, out_pad=out_w - F)

    def const_spec(*dims):
        return pl.BlockSpec(dims, lambda b, _d=len(dims): (0,) * _d)

    in_specs = [
        pl.BlockSpec((1, D, S), lambda b: (b, 0, 0)),     # image, channels-first
        pl.BlockSpec((1, N, DKK), lambda b: (b, 0, 0)),   # roi / layer-1 emb input
        const_spec(L, F, D),                              # img proj W (transposed), all layers
        const_spec(DKK, F),                               # layer-1 folded emb W
    ]
    args = [img_cf, roi0, w['wimgT'], w['wemb0']]
    if L > 1:
        in_specs.append(const_spec(L - 1, F, F))          # emb W, layers 2..L
        args.append(w['wembR'])
    in_specs += [
        const_spec(L, F, F),                              # block-diag FFN W1
        const_spec(L, F, F),                              # block-diag FFN W2
        const_spec(L, 8, F),                              # packed bias / LN vectors
        const_spec(F, F),                                 # block-diag averaging matrix
    ]
    args += [w['w1'], w['w2'], w['vecs'], w['avg']]

    return pl.pallas_call(
        kern,
        out_shape=jax.ShapeDtypeStruct((BT, N, out_w), jnp.float32),
        grid=(BT,),
        in_specs=in_specs,
        out_specs=pl.BlockSpec((1, N, out_w), lambda b: (b, 0, 0)),
        compiler_params=pltpu.CompilerParams(
            dimension_semantics=("parallel",),            # v7x: one batch per TC
            vmem_limit_bytes=32 * 1024 * 1024),
    )(*args)


# ----------------------------------------------------------------------------
# Weight packing (wrapper glue, runs once under jit)
# ----------------------------------------------------------------------------
def _pack_weights(params, *, num_layers, H, NFC, K, D):
    F = NFC * H
    wimgT, wembR, w1, w2, vecs = [], [], [], [], []
    wemb0 = None
    for l in range(num_layers):
        hp = params[l * H:(l + 1) * H]
        cat = lambda key: jnp.concatenate([p[key] for p in hp], axis=-1)

        wimg = cat('img_w')                                   # (D, F)
        wimgT.append(wimg.T)                                  # (F, D)
        bimg = cat('img_b')                                   # (F,)

        if l == 0:
            # fold downsample1 (1x1 conv) into emb_roi: exact linear composition
            wes, bes = [], []
            for p in hp:
                we = p['emb_w'].reshape(NFC, K * K, NFC)      # [f, kk, o]
                wes.append(jnp.einsum('df,fko->dko', p['roi_w'], we).reshape(D * K * K, NFC))
                bes.append(jnp.einsum('f,fko->o', p['roi_b'], we) + p['emb_b'])
            wemb0 = jnp.concatenate(wes, axis=-1)             # (D*K*K, F)
            bemb = jnp.concatenate(bes, axis=-1)              # (F,)
        else:
            wembR.append(cat('emb_w'))                        # (F, F)
            bemb = cat('emb_b')

        def block_diag(key):
            m = jnp.zeros((F, F), jnp.float32)
            for h, p in enumerate(hp):
                m = m.at[h * NFC:(h + 1) * NFC, h * NFC:(h + 1) * NFC].set(p[key])
            return m
        w1.append(block_diag('ffn_w1'))
        w2.append(block_diag('ffn_w2'))

        vecs.append(jnp.stack([bimg, bemb, cat('ffn_b1'), cat('ffn_b2'),
                               cat('ln1_g'), cat('ln1_b'), cat('ln2_g'), cat('ln2_b')]))

    avg = jnp.kron(jnp.eye(H, dtype=jnp.float32),
                   jnp.ones((NFC, NFC), jnp.float32)) / NFC   # per-head averaging (F, F)

    return dict(
        wimgT=jnp.stack(wimgT),                               # (L, F, D)
        wemb0=wemb0,                                          # (D*K*K, F)
        wembR=jnp.stack(wembR) if wembR else None,            # (L-1, F, F)
        w1=jnp.stack(w1), w2=jnp.stack(w2),                   # (L, F, F)
        vecs=jnp.stack(vecs),                                 # (L, 8, F)
        avg=avg,
    )


def multihead_forward(params, roi_feature, image_feature, *, num_layers, H, N, K, NFC):
    BT, D, OH, OW = image_feature.shape
    S = OH * OW
    F = NFC * H

    img_cf = image_feature.reshape(BT, D, S)                  # channels-first: NO transpose
    roi0 = roi_feature.reshape(BT, N, D * K * K)              # natural (d, ky, kx) flatten

    w = _pack_weights(params, num_layers=num_layers, H=H, NFC=NFC, K=K, D=D)

    out_w = ((F + 127) // 128) * 128                          # lane-dense store width
    out = fused_mhlce(img_cf, roi0, w, num_layers=num_layers, H=H, N=N, NFC=NFC,
                      out_w=out_w)                            # (BT, N, out_w)
    return out[:, :, :F].reshape(BT * N, F)


# ----------------------------------------------------------------------------
# Pure-JAX reference (mirrors the PyTorch forward, eval mode)
# ----------------------------------------------------------------------------
def _layernorm(x, g, b, eps=1e-5):
    mu = x.mean(-1, keepdims=True)
    var = ((x - mu) ** 2).mean(-1, keepdims=True)
    return (x - mu) / jnp.sqrt(var + eps) * g + b


def cet_forward_ref(p, roi, img_nchw, *, layer_id, N, K, NFC):
    BT, Dimg, OH, OW = img_nchw.shape
    img = jnp.einsum('bchw,cf->bhwf', img_nchw, p['img_w']) + p['img_b']
    img = img.reshape(BT, OH * OW, NFC)
    if layer_id == 1:
        BTN, D = roi.shape[0], roi.shape[1]
        r = jnp.einsum('ndk,df->nfk', roi.reshape(BTN, D, K * K), p['roi_w'])
        r = r + p['roi_b'][None, :, None]
        emb = r.reshape(BTN, NFC * K * K) @ p['emb_w'] + p['emb_b']
    else:
        emb = roi @ p['emb_w'] + p['emb_b']
    emb3 = emb.reshape(BT, N, NFC)
    scores = jnp.einsum('bnf,bsf->bns', emb3, img)
    A = jax.nn.softmax(scores, axis=-1)
    ctx = jnp.einsum('bns,bsf->bnf', A, img)
    x = _layernorm(ctx + emb3, p['ln1_g'], p['ln1_b'])
    h = jnp.maximum(x @ p['ffn_w1'] + p['ffn_b1'], 0.0)
    f = h @ p['ffn_w2'] + p['ffn_b2']
    y = _layernorm(x + f, p['ln2_g'], p['ln2_b'])
    return y.reshape(BT * N, NFC)


def multihead_forward_ref(params, roi_feature, image_feature, *, num_layers, H, N, K, NFC):
    roi = roi_feature
    for i in range(num_layers):
        outs = [cet_forward_ref(params[i * H + j], roi, image_feature,
                                layer_id=i + 1, N=N, K=K, NFC=NFC)
                for j in range(H)]
        roi = jnp.concatenate(outs, axis=1)
    return roi


# ----------------------------------------------------------------------------
# Deterministic parameter init (synthetic weights; no checkpoint loading)
# ----------------------------------------------------------------------------
def init_cet_params(key, layer_id, NFC, D, K, H):
    ks = jax.random.split(key, 10)
    s = 0.1
    p = {}
    if layer_id == 1:
        p['roi_w'] = jax.random.normal(ks[0], (D, NFC), jnp.float32) * s       # downsample1
        p['roi_b'] = jax.random.normal(ks[1], (NFC,), jnp.float32) * s
        p['emb_w'] = jax.random.normal(ks[2], (NFC * K * K, NFC), jnp.float32) * s
        p['emb_b'] = jax.random.normal(ks[3], (NFC,), jnp.float32) * s
    else:
        p['emb_w'] = jax.random.normal(ks[2], (NFC * H, NFC), jnp.float32) * s
        p['emb_b'] = jax.random.normal(ks[3], (NFC,), jnp.float32) * s
    # downsample2 (layer 1) / downsample (layer > 1): 1x1 conv over image channels
    p['img_w'] = jax.random.normal(ks[4], (D, NFC), jnp.float32) * s
    p['img_b'] = jax.random.normal(ks[5], (NFC,), jnp.float32) * s
    p['ffn_w1'] = jax.random.normal(ks[6], (NFC, NFC), jnp.float32) * s
    p['ffn_b1'] = jax.random.normal(ks[7], (NFC,), jnp.float32) * s
    p['ffn_w2'] = jax.random.normal(ks[8], (NFC, NFC), jnp.float32) * s
    p['ffn_b2'] = jax.random.normal(ks[9], (NFC,), jnp.float32) * s
    p['ln1_g'] = jnp.ones((NFC,), jnp.float32)
    p['ln1_b'] = jnp.zeros((NFC,), jnp.float32)
    p['ln2_g'] = jnp.ones((NFC,), jnp.float32)
    p['ln2_b'] = jnp.zeros((NFC,), jnp.float32)
    return p


# ----------------------------------------------------------------------------
if __name__ == "__main__":
    # small shapes consistent with the module (N == 12 is asserted by the model)
    B, T, N = 1, 2, 12
    BT = B * T
    D = 8            # stands in for both roi D and the 768-channel image features
    K = 3
    OH = OW = 4
    NFC = 32
    num_layers = 2
    H = 2            # num_heads_per_layer

    key = jax.random.PRNGKey(0)
    k_roi, k_img, k_par = jax.random.split(key, 3)
    roi_feature = jax.random.normal(k_roi, (BT * N, D, K, K), jnp.float32)
    image_feature = jax.random.normal(k_img, (BT, D, OH, OW), jnp.float32)

    pkeys = jax.random.split(k_par, num_layers * H)
    params = [init_cet_params(pkeys[i * H + j], i + 1, NFC, D, K, H)
              for i in range(num_layers) for j in range(H)]

    fwd = jax.jit(functools.partial(multihead_forward,
                                    num_layers=num_layers, H=H, N=N, K=K, NFC=NFC))
    out = fwd(params, roi_feature, image_feature)
    out = jax.block_until_ready(out)

    ref = multihead_forward_ref(params, roi_feature, image_feature,
                                num_layers=num_layers, H=H, N=N, K=K, NFC=NFC)
    assert out.shape == (BT * N, NFC * H)
    np.testing.assert_allclose(np.asarray(out), np.asarray(ref), rtol=2e-4, atol=2e-4)

    print("KERNEL_OK")
</pallas_src>

<mosaic_0001>
module attributes {stable_mosaic.version = 11 : i64} {
  func.func @_fused_mhlce_kernel(%arg0: i32, %arg1: memref<1x8x16xf32, #tpu.memory_space<vmem>>, %arg2: memref<1x12x72xf32, #tpu.memory_space<vmem>>, %arg3: memref<2x64x8xf32, #tpu.memory_space<vmem>>, %arg4: memref<72x64xf32, #tpu.memory_space<vmem>>, %arg5: memref<1x64x64xf32, #tpu.memory_space<vmem>>, %arg6: memref<2x64x64xf32, #tpu.memory_space<vmem>>, %arg7: memref<2x64x64xf32, #tpu.memory_space<vmem>>, %arg8: memref<2x8x64xf32, #tpu.memory_space<vmem>>, %arg9: memref<64x64xf32, #tpu.memory_space<vmem>>, %arg10: memref<1x12x128xf32, #tpu.memory_space<vmem>>) attributes {dimension_semantics = [#tpu.dimension_semantics<parallel>], iteration_bounds = array<i64: 2>, scalar_prefetch = 0 : i64, scratch_operands = 0 : i64, tpu.core_type = #tpu.core_type<tc>, window_params = [{transform_indices = @transform_0, window_bounds = array<i64: 1, 8, 16>}, {transform_indices = @transform_1, window_bounds = array<i64: 1, 12, 72>}, {pipeline_mode = #tpu.pipeline_mode<synchronous>, transform_indices = @transform_2, window_bounds = array<i64: 2, 64, 8>}, {pipeline_mode = #tpu.pipeline_mode<synchronous>, transform_indices = @transform_3, window_bounds = array<i64: 72, 64>}, {pipeline_mode = #tpu.pipeline_mode<synchronous>, transform_indices = @transform_4, window_bounds = array<i64: 1, 64, 64>}, {pipeline_mode = #tpu.pipeline_mode<synchronous>, transform_indices = @transform_5, window_bounds = array<i64: 2, 64, 64>}, {pipeline_mode = #tpu.pipeline_mode<synchronous>, transform_indices = @transform_6, window_bounds = array<i64: 2, 64, 64>}, {pipeline_mode = #tpu.pipeline_mode<synchronous>, transform_indices = @transform_7, window_bounds = array<i64: 2, 8, 64>}, {pipeline_mode = #tpu.pipeline_mode<synchronous>, transform_indices = @transform_8, window_bounds = array<i64: 64, 64>}, {transform_indices = @transform_9, window_bounds = array<i64: 1, 12, 128>}]} {
    %c0 = arith.constant 0 : index
    %c0_0 = arith.constant 0 : index
    %c0_1 = arith.constant 0 : index
    %0 = vector.load %arg1[%c0, %c0_0, %c0_1] : memref<1x8x16xf32, #tpu.memory_space<vmem>>, vector<1x8x16xf32>
    %1 = vector.shape_cast %0 : vector<1x8x16xf32> to vector<8x16xf32>
    %c0_2 = arith.constant 0 : index
    %c0_3 = arith.constant 0 : index
    %c0_4 = arith.constant 0 : index
    %2 = vector.load %arg2[%c0_2, %c0_3, %c0_4] : memref<1x12x72xf32, #tpu.memory_space<vmem>>, vector<1x12x72xf32>
    %3 = vector.shape_cast %2 : vector<1x12x72xf32> to vector<12x72xf32>
    %c0_5 = arith.constant 0 : index
    %c0_6 = arith.constant 0 : index
    %c0_7 = arith.constant 0 : index
    %4 = vector.load %arg8[%c0_5, %c0_6, %c0_7] : memref<2x8x64xf32, #tpu.memory_space<vmem>>, vector<2x8x64xf32>
    %c0_8 = arith.constant 0 : index
    %c0_9 = arith.constant 0 : index
    %5 = vector.load %arg9[%c0_8, %c0_9] : memref<64x64xf32, #tpu.memory_space<vmem>>, vector<64x64xf32>
    %6 = vector.extract_strided_slice %4 {offsets = [0, 0, 0], sizes = [1, 1, 64], strides = [1, 1, 1]} : vector<2x8x64xf32> to vector<1x1x64xf32>
    %7 = vector.shape_cast %6 : vector<1x1x64xf32> to vector<1x64xf32>
    %8 = vector.extract_strided_slice %4 {offsets = [0, 1, 0], sizes = [1, 1, 64], strides = [1, 1, 1]} : vector<2x8x64xf32> to vector<1x1x64xf32>
    %9 = vector.shape_cast %8 : vector<1x1x64xf32> to vector<1x64xf32>
    %10 = vector.extract_strided_slice %4 {offsets = [0, 2, 0], sizes = [1, 1, 64], strides = [1, 1, 1]} : vector<2x8x64xf32> to vector<1x1x64xf32>
    %11 = vector.shape_cast %10 : vector<1x1x64xf32> to vector<1x64xf32>
    %12 = vector.extract_strided_slice %4 {offsets = [0, 3, 0], sizes = [1, 1, 64], strides = [1, 1, 1]} : vector<2x8x64xf32> to vector<1x1x64xf32>
    %13 = vector.shape_cast %12 : vector<1x1x64xf32> to vector<1x64xf32>
    %14 = vector.extract_strided_slice %4 {offsets = [0, 4, 0], sizes = [1, 1, 64], strides = [1, 1, 1]} : vector<2x8x64xf32> to vector<1x1x64xf32>
    %15 = vector.shape_cast %14 : vector<1x1x64xf32> to vector<1x64xf32>
    %16 = vector.extract_strided_slice %4 {offsets = [0, 5, 0], sizes = [1, 1, 64], strides = [1, 1, 1]} : vector<2x8x64xf32> to vector<1x1x64xf32>
    %17 = vector.shape_cast %16 : vector<1x1x64xf32> to vector<1x64xf32>
    %18 = vector.extract_strided_slice %4 {offsets = [0, 6, 0], sizes = [1, 1, 64], strides = [1, 1, 1]} : vector<2x8x64xf32> to vector<1x1x64xf32>
    %19 = vector.shape_cast %18 : vector<1x1x64xf32> to vector<1x64xf32>
    %20 = vector.extract_strided_slice %4 {offsets = [0, 7, 0], sizes = [1, 1, 64], strides = [1, 1, 1]} : vector<2x8x64xf32> to vector<1x1x64xf32>
    %21 = vector.shape_cast %20 : vector<1x1x64xf32> to vector<1x64xf32>
    %c0_10 = arith.constant 0 : index
    %c0_11 = arith.constant 0 : index
    %22 = vector.load %arg4[%c0_10, %c0_11] : memref<72x64xf32, #tpu.memory_space<vmem>>, vector<72x64xf32>
    %cst = arith.constant dense<0.000000e+00> : vector<12x64xf32>
    %23 = tpu.matmul %3, %22, %cst {dimension_numbers = #tpu.dot_dimension_numbers<[1], [0], [0], [1], [0, 0, 1, 1], [], []>} : vector<12x72xf32>, vector<72x64xf32>, vector<12x64xf32> -> vector<12x64xf32>
    %24 = vector.broadcast %9 : vector<1x64xf32> to vector<12x64xf32>
    %25 = arith.addf %23, %24 : vector<12x64xf32>
    %c0_12 = arith.constant 0 : index
    %c0_13 = arith.constant 0 : index
    %c0_14 = arith.constant 0 : index
    %26 = vector.load %arg3[%c0_12, %c0_13, %c0_14] : memref<2x64x8xf32, #tpu.memory_space<vmem>>, vector<1x64x8xf32>
    %27 = vector.shape_cast %26 : vector<1x64x8xf32> to vector<64x8xf32>
    %cst_15 = arith.constant dense<0.000000e+00> : vector<64x16xf32>
    %28 = tpu.matmul %27, %1, %cst_15 {dimension_numbers = #tpu.dot_dimension_numbers<[1], [0], [0], [1], [0, 0, 1, 1], [], []>} : vector<64x8xf32>, vector<8x16xf32>, vector<64x16xf32> -> vector<64x16xf32>
    %29 = tpu.transpose %28, [1, 0] : vector<64x16xf32> -> vector<16x64xf32>
    %30 = vector.extract_strided_slice %25 {offsets = [0, 0], sizes = [12, 32], strides = [1, 1]} : vector<12x64xf32> to vector<12x32xf32>
    %31 = vector.extract_strided_slice %28 {offsets = [0, 0], sizes = [32, 16], strides = [1, 1]} : vector<64x16xf32> to vector<32x16xf32>
    %cst_16 = arith.constant dense<0.000000e+00> : vector<12x16xf32>
    %32 = tpu.matmul %30, %31, %cst_16 {dimension_numbers = #tpu.dot_dimension_numbers<[1], [0], [0], [1], [0, 0, 1, 1], [], []>} : vector<12x32xf32>, vector<32x16xf32>, vector<12x16xf32> -> vector<12x16xf32>
    %cst_17 = arith.constant dense<0xFF800000> : vector<12xf32>
    %33 = vector.multi_reduction <maximumf>, %32, %cst_17 [1] : vector<12x16xf32> to vector<12xf32>
    %34 = vector.shape_cast %33 : vector<12xf32> to vector<12x1xf32>
    %35 = vector.broadcast %34 : vector<12x1xf32> to vector<12x16xf32>
    %36 = arith.subf %32, %35 : vector<12x16xf32>
    %37 = math.exp %36 : vector<12x16xf32>
    %cst_18 = arith.constant dense<0.000000e+00> : vector<12xf32>
    %38 = vector.multi_reduction <add>, %37, %cst_18 [1] : vector<12x16xf32> to vector<12xf32>
    %39 = vector.shape_cast %38 : vector<12xf32> to vector<12x1xf32>
    %40 = tpu.reciprocal %39 : vector<12x1xf32> -> vector<12x1xf32>
    %41 = vector.broadcast %40 : vector<12x1xf32> to vector<12x16xf32>
    %42 = arith.mulf %37, %41 : vector<12x16xf32>
    %43 = vector.extract_strided_slice %29 {offsets = [0, 0], sizes = [16, 32], strides = [1, 1]} : vector<16x64xf32> to vector<16x32xf32>
    %cst_19 = arith.constant dense<0.000000e+00> : vector<12x32xf32>
    %44 = tpu.matmul %42, %43, %cst_19 {dimension_numbers = #tpu.dot_dimension_numbers<[1], [0], [0], [1], [0, 0, 1, 1], [], []>} : vector<12x16xf32>, vector<16x32xf32>, vector<12x32xf32> -> vector<12x32xf32>
    %45 = vector.extract_strided_slice %25 {offsets = [0, 32], sizes = [12, 32], strides = [1, 1]} : vector<12x64xf32> to vector<12x32xf32>
    %46 = vector.extract_strided_slice %28 {offsets = [32, 0], sizes = [32, 16], strides = [1, 1]} : vector<64x16xf32> to vector<32x16xf32>
    %cst_20 = arith.constant dense<0.000000e+00> : vector<12x16xf32>
    %47 = tpu.matmul %45, %46, %cst_20 {dimension_numbers = #tpu.dot_dimension_numbers<[1], [0], [0], [1], [0, 0, 1, 1], [], []>} : vector<12x32xf32>, vector<32x16xf32>, vector<12x16xf32> -> vector<12x16xf32>
    %cst_21 = arith.constant dense<0xFF800000> : vector<12xf32>
    %48 = vector.multi_reduction <maximumf>, %47, %cst_21 [1] : vector<12x16xf32> to vector<12xf32>
    %49 = vector.shape_cast %48 : vector<12xf32> to vector<12x1xf32>
    %50 = vector.broadcast %49 : vector<12x1xf32> to vector<12x16xf32>
    %51 = arith.subf %47, %50 : vector<12x16xf32>
    %52 = math.exp %51 : vector<12x16xf32>
    %cst_22 = arith.constant dense<0.000000e+00> : vector<12xf32>
    %53 = vector.multi_reduction <add>, %52, %cst_22 [1] : vector<12x16xf32> to vector<12xf32>
    %54 = vector.shape_cast %53 : vector<12xf32> to vector<12x1xf32>
    %55 = tpu.reciprocal %54 : vector<12x1xf32> -> vector<12x1xf32>
    %56 = vector.broadcast %55 : vector<12x1xf32> to vector<12x16xf32>
    %57 = arith.mulf %52, %56 : vector<12x16xf32>
    %58 = vector.extract_strided_slice %29 {offsets = [0, 32], sizes = [16, 32], strides = [1, 1]} : vector<16x64xf32> to vector<16x32xf32>
    %cst_23 = arith.constant dense<0.000000e+00> : vector<12x32xf32>
    %59 = tpu.matmul %57, %58, %cst_23 {dimension_numbers = #tpu.dot_dimension_numbers<[1], [0], [0], [1], [0, 0, 1, 1], [], []>} : vector<12x16xf32>, vector<16x32xf32>, vector<12x32xf32> -> vector<12x32xf32>
    %60 = tpu.concatenate %44, %59 in 1 : vector<12x32xf32>, vector<12x32xf32> -> vector<12x64xf32>
    %61 = vector.broadcast %7 : vector<1x64xf32> to vector<12x64xf32>
    %62 = arith.addf %60, %61 : vector<12x64xf32>
    %63 = arith.addf %62, %25 : vector<12x64xf32>
    %cst_24 = arith.constant dense<0.000000e+00> : vector<12x64xf32>
    %64 = tpu.matmul %63, %5, %cst_24 {dimension_numbers = #tpu.dot_dimension_numbers<[1], [0], [0], [1], [0, 0, 1, 1], [], []>} : vector<12x64xf32>, vector<64x64xf32>, vector<12x64xf32> -> vector<12x64xf32>
    %65 = arith.subf %63, %64 : vector<12x64xf32>
    %66 = arith.mulf %65, %65 : vector<12x64xf32>
    %cst_25 = arith.constant dense<0.000000e+00> : vector<12x64xf32>
    %67 = tpu.matmul %66, %5, %cst_25 {dimension_numbers = #tpu.dot_dimension_numbers<[1], [0], [0], [1], [0, 0, 1, 1], [], []>} : vector<12x64xf32>, vector<64x64xf32>, vector<12x64xf32> -> vector<12x64xf32>
    %cst_26 = arith.constant 9.99999974E-6 : f32
    %68 = vector.broadcast %cst_26 : f32 to vector<12x64xf32>
    %69 = arith.addf %67, %68 : vector<12x64xf32>
    %70 = math.rsqrt %69 : vector<12x64xf32>
    %71 = arith.mulf %65, %70 : vector<12x64xf32>
    %72 = vector.broadcast %15 : vector<1x64xf32> to vector<12x64xf32>
    %73 = arith.mulf %71, %72 : vector<12x64xf32>
    %74 = vector.broadcast %17 : vector<1x64xf32> to vector<12x64xf32>
    %75 = arith.addf %73, %74 : vector<12x64xf32>
    %c0_27 = arith.constant 0 : index
    %c0_28 = arith.constant 0 : index
    %c0_29 = arith.constant 0 : index
    %76 = vector.load %arg6[%c0_27, %c0_28, %c0_29] : memref<2x64x64xf32, #tpu.memory_space<vmem>>, vector<1x64x64xf32>
    %77 = vector.shape_cast %76 : vector<1x64x64xf32> to vector<64x64xf32>
    %cst_30 = arith.constant dense<0.000000e+00> : vector<12x64xf32>
    %78 = tpu.matmul %75, %77, %cst_30 {dimension_numbers = #tpu.dot_dimension_numbers<[1], [0], [0], [1], [0, 0, 1, 1], [], []>} : vector<12x64xf32>, vector<64x64xf32>, vector<12x64xf32> -> vector<12x64xf32>
    %79 = vector.broadcast %11 : vector<1x64xf32> to vector<12x64xf32>
    %80 = arith.addf %78, %79 : vector<12x64xf32>
    %cst_31 = arith.constant 0.000000e+00 : f32
    %81 = vector.broadcast %cst_31 : f32 to vector<12x64xf32>
    %82 = arith.maximumf %80, %81 : vector<12x64xf32>
    %c0_32 = arith.constant 0 : index
    %c0_33 = arith.constant 0 : index
    %c0_34 = arith.constant 0 : index
    %83 = vector.load %arg7[%c0_32, %c0_33, %c0_34] : memref<2x64x64xf32, #tpu.memory_space<vmem>>, vector<1x64x64xf32>
    %84 = vector.shape_cast %83 : vector<1x64x64xf32> to vector<64x64xf32>
    %cst_35 = arith.constant dense<0.000000e+00> : vector<12x64xf32>
    %85 = tpu.matmul %82, %84, %cst_35 {dimension_numbers = #tpu.dot_dimension_numbers<[1], [0], [0], [1], [0, 0, 1, 1], [], []>} : vector<12x64xf32>, vector<64x64xf32>, vector<12x64xf32> -> vector<12x64xf32>
    %86 = vector.broadcast %13 : vector<1x64xf32> to vector<12x64xf32>
    %87 = arith.addf %85, %86 : vector<12x64xf32>
    %88 = arith.addf %75, %87 : vector<12x64xf32>
    %cst_36 = arith.constant dense<0.000000e+00> : vector<12x64xf32>
    %89 = tpu.matmul %88, %5, %cst_36 {dimension_numbers = #tpu.dot_dimension_numbers<[1], [0], [0], [1], [0, 0, 1, 1], [], []>} : vector<12x64xf32>, vector<64x64xf32>, vector<12x64xf32> -> vector<12x64xf32>
    %90 = arith.subf %88, %89 : vector<12x64xf32>
    %91 = arith.mulf %90, %90 : vector<12x64xf32>
    %cst_37 = arith.constant dense<0.000000e+00> : vector<12x64xf32>
    %92 = tpu.matmul %91, %5, %cst_37 {dimension_numbers = #tpu.dot_dimension_numbers<[1], [0], [0], [1], [0, 0, 1, 1], [], []>} : vector<12x64xf32>, vector<64x64xf32>, vector<12x64xf32> -> vector<12x64xf32>
    %cst_38 = arith.constant 9.99999974E-6 : f32
    %93 = vector.broadcast %cst_38 : f32 to vector<12x64xf32>
    %94 = arith.addf %92, %93 : vector<12x64xf32>
    %95 = math.rsqrt %94 : vector<12x64xf32>
    %96 = arith.mulf %90, %95 : vector<12x64xf32>
    %97 = vector.broadcast %19 : vector<1x64xf32> to vector<12x64xf32>
    %98 = arith.mulf %96, %97 : vector<12x64xf32>
    %99 = vector.broadcast %21 : vector<1x64xf32> to vector<12x64xf32>
    %100 = arith.addf %98, %99 : vector<12x64xf32>
    %101 = vector.extract_strided_slice %4 {offsets = [1, 0, 0], sizes = [1, 1, 64], strides = [1, 1, 1]} : vector<2x8x64xf32> to vector<1x1x64xf32>
    %102 = vector.shape_cast %101 : vector<1x1x64xf32> to vector<1x64xf32>
    %103 = vector.extract_strided_slice %4 {offsets = [1, 1, 0], sizes = [1, 1, 64], strides = [1, 1, 1]} : vector<2x8x64xf32> to vector<1x1x64xf32>
    %104 = vector.shape_cast %103 : vector<1x1x64xf32> to vector<1x64xf32>
    %105 = vector.extract_strided_slice %4 {offsets = [1, 2, 0], sizes = [1, 1, 64], strides = [1, 1, 1]} : vector<2x8x64xf32> to vector<1x1x64xf32>
    %106 = vector.shape_cast %105 : vector<1x1x64xf32> to vector<1x64xf32>
    %107 = vector.extract_strided_slice %4 {offsets = [1, 3, 0], sizes = [1, 1, 64], strides = [1, 1, 1]} : vector<2x8x64xf32> to vector<1x1x64xf32>
    %108 = vector.shape_cast %107 : vector<1x1x64xf32> to vector<1x64xf32>
    %109 = vector.extract_strided_slice %4 {offsets = [1, 4, 0], sizes = [1, 1, 64], strides = [1, 1, 1]} : vector<2x8x64xf32> to vector<1x1x64xf32>
    %110 = vector.shape_cast %109 : vector<1x1x64xf32> to vector<1x64xf32>
    %111 = vector.extract_strided_slice %4 {offsets = [1, 5, 0], sizes = [1, 1, 64], strides = [1, 1, 1]} : vector<2x8x64xf32> to vector<1x1x64xf32>
    %112 = vector.shape_cast %111 : vector<1x1x64xf32> to vector<1x64xf32>
    %113 = vector.extract_strided_slice %4 {offsets = [1, 6, 0], sizes = [1, 1, 64], strides = [1, 1, 1]} : vector<2x8x64xf32> to vector<1x1x64xf32>
    %114 = vector.shape_cast %113 : vector<1x1x64xf32> to vector<1x64xf32>
    %115 = vector.extract_strided_slice %4 {offsets = [1, 7, 0], sizes = [1, 1, 64], strides = [1, 1, 1]} : vector<2x8x64xf32> to vector<1x1x64xf32>
    %116 = vector.shape_cast %115 : vector<1x1x64xf32> to vector<1x64xf32>
    %c0_39 = arith.constant 0 : index
    %c0_40 = arith.constant 0 : index
    %c0_41 = arith.constant 0 : index
    %117 = vector.load %arg5[%c0_39, %c0_40, %c0_41] : memref<1x64x64xf32, #tpu.memory_space<vmem>>, vector<1x64x64xf32>
    %118 = vector.shape_cast %117 : vector<1x64x64xf32> to vector<64x64xf32>
    %cst_42 = arith.constant dense<0.000000e+00> : vector<12x64xf32>
    %119 = tpu.matmul %100, %118, %cst_42 {dimension_numbers = #tpu.dot_dimension_numbers<[1], [0], [0], [1], [0, 0, 1, 1], [], []>} : vector<12x64xf32>, vector<64x64xf32>, vector<12x64xf32> -> vector<12x64xf32>
    %120 = vector.broadcast %104 : vector<1x64xf32> to vector<12x64xf32>
    %121 = arith.addf %119, %120 : vector<12x64xf32>
    %c1 = arith.constant 1 : index
    %c0_43 = arith.constant 0 : index
    %c0_44 = arith.constant 0 : index
    %122 = vector.load %arg3[%c1, %c0_43, %c0_44] : memref<2x64x8xf32, #tpu.memory_space<vmem>>, vector<1x64x8xf32>
    %123 = vector.shape_cast %122 : vector<1x64x8xf32> to vector<64x8xf32>
    %cst_45 = arith.constant dense<0.000000e+00> : vector<64x16xf32>
    %124 = tpu.matmul %123, %1, %cst_45 {dimension_numbers = #tpu.dot_dimension_numbers<[1], [0], [0], [1], [0, 0, 1, 1], [], []>} : vector<64x8xf32>, vector<8x16xf32>, vector<64x16xf32> -> vector<64x16xf32>
    %125 = tpu.transpose %124, [1, 0] : vector<64x16xf32> -> vector<16x64xf32>
    %126 = vector.extract_strided_slice %121 {offsets = [0, 0], sizes = [12, 32], strides = [1, 1]} : vector<12x64xf32> to vector<12x32xf32>
    %127 = vector.extract_strided_slice %124 {offsets = [0, 0], sizes = [32, 16], strides = [1, 1]} : vector<64x16xf32> to vector<32x16xf32>
    %cst_46 = arith.constant dense<0.000000e+00> : vector<12x16xf32>
    %128 = tpu.matmul %126, %127, %cst_46 {dimension_numbers = #tpu.dot_dimension_numbers<[1], [0], [0], [1], [0, 0, 1, 1], [], []>} : vector<12x32xf32>, vector<32x16xf32>, vector<12x16xf32> -> vector<12x16xf32>
    %cst_47 = arith.constant dense<0xFF800000> : vector<12xf32>
    %129 = vector.multi_reduction <maximumf>, %128, %cst_47 [1] : vector<12x16xf32> to vector<12xf32>
    %130 = vector.shape_cast %129 : vector<12xf32> to vector<12x1xf32>
    %131 = vector.broadcast %130 : vector<12x1xf32> to vector<12x16xf32>
    %132 = arith.subf %128, %131 : vector<12x16xf32>
    %133 = math.exp %132 : vector<12x16xf32>
    %cst_48 = arith.constant dense<0.000000e+00> : vector<12xf32>
    %134 = vector.multi_reduction <add>, %133, %cst_48 [1] : vector<12x16xf32> to vector<12xf32>
    %135 = vector.shape_cast %134 : vector<12xf32> to vector<12x1xf32>
    %136 = tpu.reciprocal %135 : vector<12x1xf32> -> vector<12x1xf32>
    %137 = vector.broadcast %136 : vector<12x1xf32> to vector<12x16xf32>
    %138 = arith.mulf %133, %137 : vector<12x16xf32>
    %139 = vector.extract_strided_slice %125 {offsets = [0, 0], sizes = [16, 32], strides = [1, 1]} : vector<16x64xf32> to vector<16x32xf32>
    %cst_49 = arith.constant dense<0.000000e+00> : vector<12x32xf32>
    %140 = tpu.matmul %138, %139, %cst_49 {dimension_numbers = #tpu.dot_dimension_numbers<[1], [0], [0], [1], [0, 0, 1, 1], [], []>} : vector<12x16xf32>, vector<16x32xf32>, vector<12x32xf32> -> vector<12x32xf32>
    %141 = vector.extract_strided_slice %121 {offsets = [0, 32], sizes = [12, 32], strides = [1, 1]} : vector<12x64xf32> to vector<12x32xf32>
    %142 = vector.extract_strided_slice %124 {offsets = [32, 0], sizes = [32, 16], strides = [1, 1]} : vector<64x16xf32> to vector<32x16xf32>
    %cst_50 = arith.constant dense<0.000000e+00> : vector<12x16xf32>
    %143 = tpu.matmul %141, %142, %cst_50 {dimension_numbers = #tpu.dot_dimension_numbers<[1], [0], [0], [1], [0, 0, 1, 1], [], []>} : vector<12x32xf32>, vector<32x16xf32>, vector<12x16xf32> -> vector<12x16xf32>
    %cst_51 = arith.constant dense<0xFF800000> : vector<12xf32>
    %144 = vector.multi_reduction <maximumf>, %143, %cst_51 [1] : vector<12x16xf32> to vector<12xf32>
    %145 = vector.shape_cast %144 : vector<12xf32> to vector<12x1xf32>
    %146 = vector.broadcast %145 : vector<12x1xf32> to vector<12x16xf32>
    %147 = arith.subf %143, %146 : vector<12x16xf32>
    %148 = math.exp %147 : vector<12x16xf32>
    %cst_52 = arith.constant dense<0.000000e+00> : vector<12xf32>
    %149 = vector.multi_reduction <add>, %148, %cst_52 [1] : vector<12x16xf32> to vector<12xf32>
    %150 = vector.shape_cast %149 : vector<12xf32> to vector<12x1xf32>
    %151 = tpu.reciprocal %150 : vector<12x1xf32> -> vector<12x1xf32>
    %152 = vector.broadcast %151 : vector<12x1xf32> to vector<12x16xf32>
    %153 = arith.mulf %148, %152 : vector<12x16xf32>
    %154 = vector.extract_strided_slice %125 {offsets = [0, 32], sizes = [16, 32], strides = [1, 1]} : vector<16x64xf32> to vector<16x32xf32>
    %cst_53 = arith.constant dense<0.000000e+00> : vector<12x32xf32>
    %155 = tpu.matmul %153, %154, %cst_53 {dimension_numbers = #tpu.dot_dimension_numbers<[1], [0], [0], [1], [0, 0, 1, 1], [], []>} : vector<12x16xf32>, vector<16x32xf32>, vector<12x32xf32> -> vector<12x32xf32>
    %156 = tpu.concatenate %140, %155 in 1 : vector<12x32xf32>, vector<12x32xf32> -> vector<12x64xf32>
    %157 = vector.broadcast %102 : vector<1x64xf32> to vector<12x64xf32>
    %158 = arith.addf %156, %157 : vector<12x64xf32>
    %159 = arith.addf %158, %121 : vector<12x64xf32>
    %cst_54 = arith.constant dense<0.000000e+00> : vector<12x64xf32>
    %160 = tpu.matmul %159, %5, %cst_54 {dimension_numbers = #tpu.dot_dimension_numbers<[1], [0], [0], [1], [0, 0, 1, 1], [], []>} : vector<12x64xf32>, vector<64x64xf32>, vector<12x64xf32> -> vector<12x64xf32>
    %161 = arith.subf %159, %160 : vector<12x64xf32>
    %162 = arith.mulf %161, %161 : vector<12x64xf32>
    %cst_55 = arith.constant dense<0.000000e+00> : vector<12x64xf32>
    %163 = tpu.matmul %162, %5, %cst_55 {dimension_numbers = #tpu.dot_dimension_numbers<[1], [0], [0], [1], [0, 0, 1, 1], [], []>} : vector<12x64xf32>, vector<64x64xf32>, vector<12x64xf32> -> vector<12x64xf32>
    %cst_56 = arith.constant 9.99999974E-6 : f32
    %164 = vector.broadcast %cst_56 : f32 to vector<12x64xf32>
    %165 = arith.addf %163, %164 : vector<12x64xf32>
    %166 = math.rsqrt %165 : vector<12x64xf32>
    %167 = arith.mulf %161, %166 : vector<12x64xf32>
    %168 = vector.broadcast %110 : vector<1x64xf32> to vector<12x64xf32>
    %169 = arith.mulf %167, %168 : vector<12x64xf32>
    %170 = vector.broadcast %112 : vector<1x64xf32> to vector<12x64xf32>
    %171 = arith.addf %169, %170 : vector<12x64xf32>
    %c1_57 = arith.constant 1 : index
    %c0_58 = arith.constant 0 : index
    %c0_59 = arith.constant 0 : index
    %172 = vector.load %arg6[%c1_57, %c0_58, %c0_59] : memref<2x64x64xf32, #tpu.memory_space<vmem>>, vector<1x64x64xf32>
    %173 = vector.shape_cast %172 : vector<1x64x64xf32> to vector<64x64xf32>
    %cst_60 = arith.constant dense<0.000000e+00> : vector<12x64xf32>
    %174 = tpu.matmul %171, %173, %cst_60 {dimension_numbers = #tpu.dot_dimension_numbers<[1], [0], [0], [1], [0, 0, 1, 1], [], []>} : vector<12x64xf32>, vector<64x64xf32>, vector<12x64xf32> -> vector<12x64xf32>
    %175 = vector.broadcast %106 : vector<1x64xf32> to vector<12x64xf32>
    %176 = arith.addf %174, %175 : vector<12x64xf32>
    %cst_61 = arith.constant 0.000000e+00 : f32
    %177 = vector.broadcast %cst_61 : f32 to vector<12x64xf32>
    %178 = arith.maximumf %176, %177 : vector<12x64xf32>
    %c1_62 = arith.constant 1 : index
    %c0_63 = arith.constant 0 : index
    %c0_64 = arith.constant 0 : index
    %179 = vector.load %arg7[%c1_62, %c0_63, %c0_64] : memref<2x64x64xf32, #tpu.memory_space<vmem>>, vector<1x64x64xf32>
    %180 = vector.shape_cast %179 : vector<1x64x64xf32> to vector<64x64xf32>
    %cst_65 = arith.constant dense<0.000000e+00> : vector<12x64xf32>
    %181 = tpu.matmul %178, %180, %cst_65 {dimension_numbers = #tpu.dot_dimension_numbers<[1], [0], [0], [1], [0, 0, 1, 1], [], []>} : vector<12x64xf32>, vector<64x64xf32>, vector<12x64xf32> -> vector<12x64xf32>
    %182 = vector.broadcast %108 : vector<1x64xf32> to vector<12x64xf32>
    %183 = arith.addf %181, %182 : vector<12x64xf32>
    %184 = arith.addf %171, %183 : vector<12x64xf32>
    %cst_66 = arith.constant dense<0.000000e+00> : vector<12x64xf32>
    %185 = tpu.matmul %184, %5, %cst_66 {dimension_numbers = #tpu.dot_dimension_numbers<[1], [0], [0], [1], [0, 0, 1, 1], [], []>} : vector<12x64xf32>, vector<64x64xf32>, vector<12x64xf32> -> vector<12x64xf32>
    %186 = arith.subf %184, %185 : vector<12x64xf32>
    %187 = arith.mulf %186, %186 : vector<12x64xf32>
    %cst_67 = arith.constant dense<0.000000e+00> : vector<12x64xf32>
    %188 = tpu.matmul %187, %5, %cst_67 {dimension_numbers = #tpu.dot_dimension_numbers<[1], [0], [0], [1], [0, 0, 1, 1], [], []>} : vector<12x64xf32>, vector<64x64xf32>, vector<12x64xf32> -> vector<12x64xf32>
    %cst_68 = arith.constant 9.99999974E-6 : f32
    %189 = vector.broadcast %cst_68 : f32 to vector<12x64xf32>
    %190 = arith.addf %188, %189 : vector<12x64xf32>
    %191 = math.rsqrt %190 : vector<12x64xf32>
    %192 = arith.mulf %186, %191 : vector<12x64xf32>
    %193 = vector.broadcast %114 : vector<1x64xf32> to vector<12x64xf32>
    %194 = arith.mulf %192, %193 : vector<12x64xf32>
    %195 = vector.broadcast %116 : vector<1x64xf32> to vector<12x64xf32>
    %196 = arith.addf %194, %195 : vector<12x64xf32>
    %cst_69 = arith.constant 0.000000e+00 : f32
    %197 = vector.broadcast %cst_69 : f32 to vector<12x64xf32>
    %198 = tpu.concatenate %196, %197 in 1 : vector<12x64xf32>, vector<12x64xf32> -> vector<12x128xf32>
    %c0_70 = arith.constant 0 : index
    %c0_71 = arith.constant 0 : index
    %c0_72 = arith.constant 0 : index
    %199 = vector.load %arg10[%c0_70, %c0_71, %c0_72] : memref<1x12x128xf32, #tpu.memory_space<vmem>>, vector<1x12x128xf32>
    %200 = vector.shape_cast %199 : vector<1x12x128xf32> to vector<12x128xf32>
    %201 = vector.shape_cast %198 : vector<12x128xf32> to vector<1x12x128xf32>
    tpu.vector_store %arg10[%c0_70, %c0_71, %c0_72], %201 {strides = array<i32>} : memref<1x12x128xf32, #tpu.memory_space<vmem>>, vector<1x12x128xf32>,
    return
  }
  func.func @transform_0(%arg0: i32) -> (i32, i32, i32) {
    %c0_i32 = arith.constant 0 : i32
    %c0_i32_0 = arith.constant 0 : i32
    %c0_i32_1 = arith.constant 0 : i32
    return %arg0, %c0_i32, %c0_i32_0 : i32, i32, i32
  }
  func.func @transform_1(%arg0: i32) -> (i32, i32, i32) {
    %c0_i32 = arith.constant 0 : i32
    %c0_i32_0 = arith.constant 0 : i32
    %c0_i32_1 = arith.constant 0 : i32
    return %arg0, %c0_i32, %c0_i32_0 : i32, i32, i32
  }
  func.func @transform_2(%arg0: i32) -> (i32, i32, i32) {
    %c0_i32 = arith.constant 0 : i32
    %c0_i32_0 = arith.constant 0 : i32
    %c0_i32_1 = arith.constant 0 : i32
    %c0_i32_2 = arith.constant 0 : i32
    return %c0_i32, %c0_i32_0, %c0_i32_1 : i32, i32, i32
  }
  func.func @transform_3(%arg0: i32) -> (i32, i32) {
    %c0_i32 = arith.constant 0 : i32
    %c0_i32_0 = arith.constant 0 : i32
    %c0_i32_1 = arith.constant 0 : i32
    return %c0_i32, %c0_i32_0 : i32, i32
  }
  func.func @transform_4(%arg0: i32) -> (i32, i32, i32) {
    %c0_i32 = arith.constant 0 : i32
    %c0_i32_0 = arith.constant 0 : i32
    %c0_i32_1 = arith.constant 0 : i32
    %c0_i32_2 = arith.constant 0 : i32
    return %c0_i32, %c0_i32_0, %c0_i32_1 : i32, i32, i32
  }
  func.func @transform_5(%arg0: i32) -> (i32, i32, i32) {
    %c0_i32 = arith.constant 0 : i32
    %c0_i32_0 = arith.constant 0 : i32
    %c0_i32_1 = arith.constant 0 : i32
    %c0_i32_2 = arith.constant 0 : i32
    return %c0_i32, %c0_i32_0, %c0_i32_1 : i32, i32, i32
  }
  func.func @transform_6(%arg0: i32) -> (i32, i32, i32) {
    %c0_i32 = arith.constant 0 : i32
    %c0_i32_0 = arith.constant 0 : i32
    %c0_i32_1 = arith.constant 0 : i32
    %c0_i32_2 = arith.constant 0 : i32
    return %c0_i32, %c0_i32_0, %c0_i32_1 : i32, i32, i32
  }
  func.func @transform_7(%arg0: i32) -> (i32, i32, i32) {
    %c0_i32 = arith.constant 0 : i32
    %c0_i32_0 = arith.constant 0 : i32
    %c0_i32_1 = arith.constant 0 : i32
    %c0_i32_2 = arith.constant 0 : i32
    return %c0_i32, %c0_i32_0, %c0_i32_1 : i32, i32, i32
  }
  func.func @transform_8(%arg0: i32) -> (i32, i32) {
    %c0_i32 = arith.constant 0 : i32
    %c0_i32_0 = arith.constant 0 : i32
    %c0_i32_1 = arith.constant 0 : i32
    return %c0_i32, %c0_i32_0 : i32, i32
  }
  func.func @transform_9(%arg0: i32) -> (i32, i32, i32) {
    %c0_i32 = arith.constant 0 : i32
    %c0_i32_0 = arith.constant 0 : i32
    %c0_i32_1 = arith.constant 0 : i32
    return %arg0, %c0_i32, %c0_i32_0 : i32, i32, i32
  }
}

</mosaic_0001>

<bundles_post_ra>
// kernel: multihead_forward.1
= control target key start
LH: loop header
LB: loop body
LE: loop exit
PB: predicated region body
PF: predicated region fallthrough
CT: control target
= control target key end

     0   :  { %s3963_s30 = smov 0   ;;  %s4516_s0 = inlined_call_operand.vmem [shape: f32[2,8,16], index: 0, kind: input, shape index: {}]   ;;  %s4517_s1 = inlined_call_operand.vmem [shape: f32[2,12,72], index: 1, kind: input, shape index: {}]   ;;  %s4518_s2 = inlined_call_operand.vmem [shape: f32[2,64,8], index: 2, kind: input, shape index: {}]   ;;  %s4519_s3 = inlined_call_operand.vmem [shape: f32[72,64], index: 3, kind: input, shape index: {}]   ;;  %s4520_s4 = inlined_call_operand.vmem [shape: f32[1,64,64], index: 4, kind: input, shape index: {}]   ;;  %s4521_s5 = inlined_call_operand.vmem [shape: f32[2,64,64], index: 5, kind: input, shape index: {}]   ;;  %s4522_s6 = inlined_call_operand.vmem [shape: f32[2,64,64], index: 6, kind: input, shape index: {}]   ;;  %s4523_s7 = inlined_call_operand.vmem [shape: f32[2,8,64], index: 7, kind: input, shape index: {}]   ;;  %s4524_s8 = inlined_call_operand.vmem [shape: f32[64,64], index: 8, kind: input, shape index: {}]   ;;  %s4525_s9 = inlined_call_operand.vmem [shape: f32[2,12,128], index: 9, kind: output, shape index: {}]  }
   0x1 LB: > { %s2836_s10 = sadd.s32 4294967295, %s3909_s30   ;;  %p2840_p0 = scmp.ge.s32.totalorder %s3909_s30, 1  ;;  %s3909_s30 = sphi %s3963_s30, %s19_s30  }
   0x2   : > { %p296_p1 = scmp.lt.s32.totalorder %s3909_s30, 3 }
   0x4   : > { %p297_p2 = pnand %p2840_p0, %p296_p1 }
   0x5   : > { %v363_v0 = vld [vmem:[%s4519_s3] sm:$0xff] (!%p297_p2)  ;;  %v364_v1 = vld [vmem:[%s4519_s3 + $0x8] sm:$0xff] (!%p297_p2)  ;;  %v365_v2 = vld [vmem:[%s4519_s3 + $0x10] sm:$0xff] (!%p297_p2)  ;;  %p336_p3 = scmp.lt.s32.totalorder (!%p297_p2), %s2836_s10, 1  ;;  %vm376_vm0 = vcmask (!%p297_p2), 588800   ;;  %vm466_vm1 = vcmask (!%p297_p2), 64512   ;;  %v372_v24 = vlaneseq (!%p297_p2) }
   0x6   : > { %300 = sbr.rel (%p297_p2) target bundleno = 5098 (0x13ea), region = 56  ;;  %v3541_v3 = vpack.c.bf16 (!%p297_p2), %v364_v1, %v363_v0  ;;  %v366_v4 = vld [vmem:[%s4519_s3 + $0x18] sm:$0xff] (!%p297_p2)  ;;  %v367_v6 = vld [vmem:[%s4519_s3 + $0x20] sm:$0xff] (!%p297_p2)  ;;  %v368_v7 = vld [vmem:[%s4519_s3 + $0x28] sm:$0xff] (!%p297_p2)  ;;  %vm596_vm2 = vcmask (!%p297_p2), 261120   ;;  %vm678_vm3 = vcmask (!%p297_p2), 130048  }
   0x7   : > { %v3545_v5 = vpack.c.bf16 (!%p297_p2), %v366_v4, %v365_v2  ;;  %v3549_v8 = vpack.c.bf16 (!%p297_p2), %v368_v7, %v367_v6  ;;  %v369_v9 = vld [vmem:[%s4519_s3 + $0x30] sm:$0xff] (!%p297_p2)  ;;  %v370_v10 = vld [vmem:[%s4519_s3 + $0x38] sm:$0xff] (!%p297_p2)  ;;  %v371_v13 = vld [vmem:[%s4519_s3 + $0x40] sm:$0xff] (!%p297_p2)  ;;  %v4048_v25 = vshrl.u32 (!%p297_p2), %v372_v24, 7  ;;  %s3911_s18 = smov (!%p297_p2), 96   ;;  %vm682_vm5 = vcmask (!%p297_p2), 125952  }
   0x8   : > { %3542 = vmatprep.subr.bf16.mxu0 (!%p297_p2), %v3541_v3  ;;  %v3553_v12 = vpack.c.bf16 (!%p297_p2), %v370_v10, %v369_v9  ;;  %v458_v16 = vld [vmem:[%s4518_s2] sm:$0xff] (!%p297_p2)  ;;  %v459_v17 = vld [vmem:[%s4518_s2 + $0x8] sm:$0xff] (!%p297_p2)  ;;  %v460_v18 = vld [vmem:[%s4518_s2 + $0x10] sm:$0xff] (!%p297_p2)  ;;  %vm1011_vm6 = vcmask (!%p297_p2), 523264  }
   0x9   : > { %3544 = vmatpush3.bf16.msra.mxu0 (!%p297_p2), %v3541_v3  ;;  %v461_v19 = vld [vmem:[%s4518_s2 + $0x18] sm:$0xff] (!%p297_p2)  ;;  %v462_v20 = vld [vmem:[%s4518_s2 + $0x20] sm:$0xff] (!%p297_p2)  ;;  %v463_v21 = vld [vmem:[%s4518_s2 + $0x28] sm:$0xff] (!%p297_p2)  ;;  %v374_v26 = vsub.s32 (!%p297_p2), 1, %v4048_v25 }
   0xa   : > { %3546 = vmatprep.subr.bf16.mxu0 (!%p297_p2), %v3545_v5  ;;  %v464_v22 = vld [vmem:[%s4518_s2 + $0x30] sm:$0xff] (!%p297_p2)  ;;  %v465_v23 = vld [vmem:[%s4518_s2 + $0x38] sm:$0xff] (!%p297_p2)  ;;  %v4054_v27 = vld [vmem:[%s4523_s7] sm:$0xff] (!%p297_p2) }
   0xb   : > { %v375_v28 = vrot.slane (!%p297_p2), %v4054_v27, %v374_v26  ;;  %vm4069_vm4 = vmpackc.low (!%p297_p2), %vm678_vm3, %vm678_vm3 }
   0xd   : > { %s4529_s10 = smov (!%p336_p3, %s2836_s10), 1  ;;  %3548 = vmatpush3.bf16.msra.mxu0 %v3545_v5 }
   0xe   : > { %s2948_s23 = sshll.u32 %s4529_s10, 4  ;;  %3550 = vmatprep.subr.bf16.mxu0 %v3549_v8  ;;  %s2841_s12 = sshll.u32 %s4529_s10, 3 }
   0xf   : > { %s344_s26 = scalar_lea.vmem %s4517_s1, %s2948_s23  ;;  %s339_s17 = scalar_lea.vmem %s4516_s0, %s2841_s12 }
  0x10   : > { %v351_v11 = vld [vmem:[%s344_s26] sm:$0xff]  ;;  %v352_v14 = vld [vmem:[%s344_s26 + $0x8] sm:$0xf]  ;;  %s349_s19 = scalar_lea.vmem %s4525_s9, %s2948_s23 }
  0x11   : > { %3175 = vmatprep.mubr.msk.f32.mxu0 %vm376_vm0, %v351_v11  ;;  %3552 = vmatpush3.bf16.msra.mxu0 %v3549_v8  ;;  %v4011_v15 = vld [vmem:[%s339_s17] sm:$0xff]  ;;  %s3912_s17 = smov 32  }
  0x12   : > { %3554 = vmatprep.subr.bf16.mxu0 %v3553_v12 }
  0x15   : > { %3556 = vmatpush3.bf16.msra.mxu0 %v3553_v12 }
  0x16   : > { %3173 = vmatprep.subr.mxu0 %v371_v13 }
  0x19   : > { %3174 = vmatpush3.msra.mxu0 %v371_v13 }
  0x1a   : > { %3176 = vmatmul.mubr.msk.f32.vlgmr.msra.gmra.mrb[0].mxu0 %vm376_vm0, %v352_v14  ;;  %3178 = vmatprep.subr.mxu0 %v4011_v15 }
  0x1b   : > { %3179 = vmatpush3.msra.mxu0 %v4011_v15  ;;  %3180 = vmatprep.mubr.msk.f32.mxu0 %vm466_vm1, %v458_v16 }
  0x1e   : > { %3181 = vmatmul.mubr.msk.f32.vlgmr.msra.gmra.mrb[2].mxu0 %vm466_vm1, %v459_v17 }
  0x1f   : > { %3183 = vmatprep.mubr.msk.f32.mxu0 %vm466_vm1, %v460_v18 }
  0x22   : > { %3184 = vmatmul.mubr.msk.f32.gmra.mrb[4].mxu0 %vm466_vm1, %v461_v19 }
  0x23   : > { %3186 = vmatprep.mubr.msk.f32.mxu0 %vm466_vm1, %v462_v20 }
  0x26   : > { %3187 = vmatmul.mubr.msk.f32.gmra.mrb[6].mxu0 %vm466_vm1, %v463_v21 }
  0x27   : > { %3189 = vmatprep.mubr.msk.f32.mxu0 %vm466_vm1, %v464_v22 }
  0x2a   : > { %3190 = vmatmul.mubr.msk.f32.gmra.mrb[8].mxu0 %vm466_vm1, %v465_v23 }
  0xed   : > { %v3177_v29 = vpop.f32.mrb[0].mxu0 }
  0xee   : > { %v449_v30 = vpop.f32.mrb[1].mxu0  ;;  %v4065_v34 = vadd.f32 %v3177_v29, %v375_v28  ;;  %v356_v29 = vld [vmem:[%s4524_s8 + $0x8] sm:$0xff] }
  0xef   : > { %v4059_v31 = vadd.f32 %v449_v30, %v375_v28  ;;  %v355_v28 = vld [vmem:[%s4524_s8] sm:$0xff]  ;;  %v357_v30 = vld [vmem:[%s4524_s8 + $0x10] sm:$0xff] }
  0xf1   : > { %795 = vrot.lane.b32.xlu0 %v4059_v31, %s3911_s18  ;;  %v3182_v32 = vpop.f32.mrb[2].mxu0  ;;  %3200 = vmatprep.mubr.msk.f32.mxu1 %vm596_vm2, %v4059_v31 }
  0xf2   : > { %v557_v33 = vpop.f32.mrb[3].mxu0 }
  0xf3   : > { %v3557_v35 = vpack.c.bf16 %v3182_v32, %v557_v33  ;;  %v4116_v32 = vpack.c.bf16 %v356_v29, %v355_v28  ;;  %v358_v33 = vld [vmem:[%s4524_s8 + $0x18] sm:$0xff] }
  0xf5   : > { %797 = vrot.lane.b32.xlu0 %v4065_v34, %s3911_s18  ;;  %v3185_v37 = vpop.f32.mrb[4].mxu0  ;;  %3558 = vmatprep.subr.bf16.mxu1 %v3557_v35 }
  0xf6   : > { %v567_v38 = vpop.f32.mrb[5].mxu0  ;;  %3560 = vmatpush3.bf16.msra.mxu1 %v3557_v35  ;;  %3567 = vmatprep.subr.msk.bf16.mxu0 %vm4069_vm4, %v3557_v35 }
  0xf7   : > { %v3561_v39 = vpack.c.bf16 %v3185_v37, %v567_v38  ;;  %3570 = vmatpush3.bf16.xpose.msk.msra.mxu0 %vm4069_vm4, %v3557_v35  ;;  %v4121_v35 = vpack.c.bf16 %v358_v33, %v357_v30  ;;  %v359_v37 = vld [vmem:[%s4524_s8 + $0x20] sm:$0xff]  ;;  %v360_v38 = vld [vmem:[%s4524_s8 + $0x28] sm:$0xff] }
  0xf9   : > { %3562 = vmatprep.subr.bf16.mxu1 %v3561_v39  ;;  %v3188_v40 = vpop.f32.mrb[6].mxu0  ;;  %3573 = vmatprep.subr.msk.bf16.mxu0 %vm4069_vm4, %v3561_v39 }
  0xfa   : > { %3564 = vmatpush3.bf16.msra.mxu1 %v3561_v39  ;;  %v577_v41 = vpop.f32.mrb[7].mxu0 }
  0xfb   : > { %v3577_v42 = vpack.c.bf16 %v3188_v40, %v577_v41  ;;  %v361_v40 = vld [vmem:[%s4524_s8 + $0x30] sm:$0xff]  ;;  %v362_v41 = vld [vmem:[%s4524_s8 + $0x38] sm:$0xff] }
  0xfd   : > { %3201 = vmatmul.mubr.msk.f32.vlgmr.msra.gmra.mrb[0].mxu1 %vm596_vm2, %v4065_v34  ;;  %v3191_v43 = vpop.f32.mrb[8].mxu0  ;;  %3578 = vmatprep.subr.bf16.mxu1 %v3577_v42 }
  0xfe   : > { %v587_v44 = vpop.f32.mrb[9].mxu0  ;;  %3580 = vmatpush3.bf16.msra.mxu1 %v3577_v42 }
  0xff   : > { %v3581_v45 = vpack.c.bf16 %v3191_v43, %v587_v44  ;;  %3576 = vmatpush3.bf16.xpose.msk.msra.mxu0 %vm4069_vm4, %v3561_v39  ;;  %v4137_v39 = vpack.c.bf16 %v360_v38, %v359_v37 }
 0x100   : > { %3598 = vmatprep.subr.bf16.mxu0 %v4116_v32 }
 0x101   : > { %3582 = vmatprep.subr.bf16.mxu1 %v3581_v45 }
 0x102   : > { %3584 = vmatpush3.bf16.msra.mxu1 %v3581_v45 }
 0x103   : > { %3587 = vmatprep.subr.msk.bf16.mxu1 %vm4069_vm4, %v3577_v42 }
 0x163   : > { %v796_v46 = vpop.permute.xlu0 %795 }
 0x164   : > { %3222 = vmatprep.mubr.msk.f32.mxu1 %vm596_vm2, %v796_v46 }
 0x167   : > { %v798_v47 = vpop.permute.xlu0 %797 }
 0x168   : > { %3223 = vmatmul.mubr.msk.f32.vlgmr.msra.gmra.mrb[2].mxu1 %vm596_vm2, %v798_v47  ;;  %v1005_v47 = vsub.s32 0, %v4048_v25 }
 0x169   : > { %3590 = vmatpush3.bf16.xpose.msk.msra.mxu1 %vm4069_vm4, %v3577_v42  ;;  %v4149_v42 = vpack.c.bf16 %v362_v41, %v361_v40 }
 0x16a   : > { %3593 = vmatprep.subr.msk.bf16.mxu1 %vm4069_vm4, %v3581_v45 }
 0x171   : > { %3596 = vmatpush3.bf16.xpose.msk.msra.mxu1 %vm4069_vm4, %v3581_v45 }
 0x172   : > { %3614 = vmatprep.subr.bf16.mxu1 %v4116_v32 }
 0x1d0   : > { %v3202_v48 = vpop.f32.mrb[0].mxu1 }
 0x1d1   : > { %v669_v49 = vpop.f32.mrb[1].mxu1  ;;  %v683_v55 = vsel %vm682_vm5, %v3202_v48, -inf }
 0x1d2   : > { %v679_v50 = vsel %vm678_vm3, %v669_v49, -inf }
 0x1d3   : > { %680 = vmax.xlane.f32.xlu0 %v679_v50 }
 0x23b   : > { %v3224_v51 = vpop.f32.mrb[2].mxu1 }
 0x23c   : > { %v869_v52 = vpop.f32.mrb[3].mxu1  ;;  %v881_v54 = vsel %vm682_vm5, %v3224_v51, -inf }
 0x23d   : > { %v878_v53 = vsel %vm678_vm3, %v869_v52, -inf }
 0x23e   : > { %879 = vmax.xlane.f32.xlu1 %v878_v53 }
 0x242   : > { %882 = vmax.xlane.f32.xlu1 %v881_v54 }
 0x246   : > { %684 = vmax.xlane.f32.xlu1 %v683_v55 }
 0x260   : > { %v681_v56 = vpop.xlane.xlu0 %680 }
 0x261   : > { %v686_v59 = vsub.f32 %v669_v49, %v681_v56 }
 0x263   : > { %v688_v63 = vmul.f32 1.442695, %v686_v59 }
 0x2cb   : > { %v880_v57 = vpop.xlane.xlu1 %879 }
 0x2cc   : > { %v884_v58 = vsub.f32 %v869_v52, %v880_v57 }
 0x2ce   : > { %v886_v60 = vmul.f32 1.442695, %v884_v58 }
 0x2cf   : > { %v883_v61 = vpop.xlane.xlu1 %882 }
 0x2d0   : > { %3855 = vpow2.f32 %v886_v60  ;;  %v885_v62 = vsub.f32 %v3224_v51, %v883_v61 }
 0x2d2   : > { %v888_v0 = vmul.f32 1.442695, %v885_v62 }
 0x2d3   : > { %v685_v1 = vpop.xlane.xlu1 %684 }
 0x2d4   : > { %3857 = vpow2.f32 %v888_v0  ;;  %v687_v2 = vsub.f32 %v3202_v48, %v685_v1  ;;  %v1006_v48 = vrot.slane %v4054_v27, %v1005_v47  ;;  %v1196_v0 = vld [vmem:[%s4521_s5 + $0x10] sm:$0xff]  ;;  %v1197_v1 = vld [vmem:[%s4521_s5 + $0x18] sm:$0xff] }
 0x2d5   : > { %3859 = vpow2.f32 %v688_v63 }
 0x2d6   : > { %v690_v3 = vmul.f32 1.442695, %v687_v2  ;;  %v3633_v2 = vpack.c.bf16 %v1197_v1, %v1196_v0 }
 0x2d8   : > { %3861 = vpow2.f32 %v690_v3  ;;  %v1198_v3 = vld [vmem:[%s4521_s5 + $0x20] sm:$0xff] }
 0x2da   : > { %v3856_v4 = vpop.eup %3855 }
 0x2db   : > { %v890_v5 = vsel %vm678_vm3, %v3856_v4, 0.0 }
 0x2dc   : > { %891 = vadd.xlane.f32.xlu1 %v890_v5 }
 0x2de   : > { %v3858_v6 = vpop.eup %3857 }
 0x2df   : > { %v893_v7 = vsel %vm682_vm5, %v3858_v6, 0.0  ;;  %v3860_v8 = vpop.eup %3859 }
 0x2e0   : > { %894 = vadd.xlane.f32.xlu1 %v893_v7  ;;  %v692_v9 = vsel %vm678_vm3, %v3860_v8, 0.0  ;;  %v1201_v7 = vld [vmem:[%s4521_s5 + $0x38] sm:$0xff] }
 0x2e2   : > { %v3862_v10 = vpop.eup %3861 }
 0x2e3   : > { %v695_v11 = vsel %vm682_vm5, %v3862_v10, 0.0 }
 0x2e4   : > { %693 = vadd.xlane.f32.xlu1 %v692_v9  ;;  %v1289_v9 = vld [vmem:[%s4522_s6] sm:$0xff] }
 0x2e8   : > { %696 = vadd.xlane.f32.xlu1 %v695_v11  ;;  %v1291_v11 = vld [vmem:[%s4522_s6 + $0x10] sm:$0xff] }
 0x369   : > { %v892_v12 = vpop.xlane.xlu1 %891 }
 0x36a   : > { %3863 = vrcp.f32 %v892_v12 }
 0x36d   : > { %v895_v13 = vpop.xlane.xlu1 %894 }
 0x36e   : > { %3865 = vrcp.f32 %v895_v13  ;;  %v1292_v13 = vld [vmem:[%s4522_s6 + $0x18] sm:$0xff] }
 0x371   : > { %v694_v14 = vpop.xlane.xlu1 %693 }
 0x372   : > { %3867 = vrcp.f32 %v694_v14  ;;  %v3649_v14 = vpack.c.bf16 %v1292_v13, %v1291_v11  ;;  %v1571_v11 = vld [vmem:[%s4520_s4 + $0x28] sm:$0xff]  ;;  %v2886_v13 = vld [vmem:[%s4518_s2 + $0x40] sm:$0xff] }
 0x374   : > { %v3864_v16 = vpop.eup %3863 }
 0x375   : > { %v697_v17 = vpop.xlane.xlu1 %696  ;;  %v898_v18 = vmul.f32 %v3864_v16, %v3856_v4  ;;  %v1199_v4 = vld [vmem:[%s4521_s5 + $0x28] sm:$0xff]  ;;  %v1293_v16 = vld [vmem:[%s4522_s6 + $0x20] sm:$0xff] }
 0x376   : > { %3869 = vrcp.f32 %v697_v17  ;;  %v3637_v5 = vpack.c.bf16 %v1199_v4, %v1198_v3  ;;  %v1294_v17 = vld [vmem:[%s4522_s6 + $0x28] sm:$0xff] }
 0x377   : > { %3233 = vmatprep.mubr.msk.f32.mxu1 %vm678_vm3, %v898_v18  ;;  %v3653_v18 = vpack.c.bf16 %v1294_v17, %v1293_v16  ;;  %v1572_v16 = vld [vmem:[%s4520_s4 + $0x30] sm:$0xff]  ;;  %v1573_v17 = vld [vmem:[%s4520_s4 + $0x38] sm:$0xff] }
 0x378   : > { %v3866_v19 = vpop.eup %3865 }
 0x379   : > { %v899_v20 = vmul.f32 %v3866_v19, %v3858_v6  ;;  %v1200_v6 = vld [vmem:[%s4521_s5 + $0x30] sm:$0xff] }
 0x37b   : > { %3234 = vmatmul.mubr.msk.f32.vlgmr.msra.gmra.mrb[4].mxu1 %vm678_vm3, %v899_v20 }
 0x37c   : > { %v3868_v21 = vpop.eup %3867  ;;  %3616 = vmatpush3.bf16.msra.mxu1 %v4116_v32 }
 0x37d   : > { %v700_v22 = vmul.f32 %v3868_v21, %v3860_v8  ;;  %3618 = vmatprep.subr.bf16.mxu1 %v4121_v35  ;;  %v3641_v8 = vpack.c.bf16 %v1201_v7, %v1200_v6  ;;  %v1567_v6 = vld [vmem:[%s4520_s4 + $0x8] sm:$0xff] }
 0x37f   : > { %3211 = vmatprep.mubr.msk.f32.mxu0 %vm678_vm3, %v700_v22 }
 0x380   : > { %v3870_v23 = vpop.eup %3869  ;;  %3620 = vmatpush3.bf16.msra.mxu1 %v4121_v35 }
 0x381   : > { %v701_v24 = vmul.f32 %v3870_v23, %v3862_v10  ;;  %3622 = vmatprep.subr.bf16.mxu1 %v4137_v39  ;;  %v1290_v10 = vld [vmem:[%s4522_s6 + $0x8] sm:$0xff]  ;;  %v1184_v23 = vsub.s32 4, %v4048_v25 }
 0x382   : > { %v3645_v12 = vpack.c.bf16 %v1290_v10, %v1289_v9  ;;  %v1569_v9 = vld [vmem:[%s4520_s4 + $0x18] sm:$0xff]  ;;  %v1570_v10 = vld [vmem:[%s4520_s4 + $0x20] sm:$0xff] }
 0x383   : > { %3212 = vmatmul.mubr.msk.f32.vlgmr.msra.gmra.mrb[10].mxu0 %vm678_vm3, %v701_v24  ;;  %v1190_v24 = vsub.s32 5, %v4048_v25  ;;  %v1185_v28 = vrot.slane %v4054_v27, %v1184_v23 }
 0x384   : > { %3600 = vmatpush3.bf16.msra.mxu0 %v4116_v32  ;;  %3624 = vmatpush3.bf16.msra.mxu1 %v4137_v39 }
 0x385   : > { %3602 = vmatprep.subr.bf16.mxu0 %v4121_v35  ;;  %3626 = vmatprep.subr.bf16.mxu1 %v4149_v42  ;;  %v1191_v38 = vrot.slane %v4054_v27, %v1190_v24 }
 0x388   : > { %3604 = vmatpush3.bf16.msra.mxu0 %v4121_v35  ;;  %3628 = vmatpush3.bf16.msra.mxu1 %v4149_v42 }
 0x389   : > { %3606 = vmatprep.subr.bf16.mxu0 %v4137_v39  ;;  %3646 = vmatprep.subr.bf16.mxu1 %v3645_v12 }
 0x38c   : > { %3608 = vmatpush3.bf16.msra.mxu0 %v4137_v39 }
 0x38d   : > { %3610 = vmatprep.subr.bf16.mxu0 %v4149_v42 }
 0x390   : > { %3612 = vmatpush3.bf16.msra.mxu0 %v4149_v42 }
 0x44e   : > { %v3235_v43 = vpop.f32.mrb[4].mxu1 }
 0x44f   : > { %997 = vrot.lane.b32.xlu0 %v3235_v43, %s3912_s17  ;;  %v984_v44 = vpop.f32.mrb[5].mxu1 }
 0x450   : > { %995 = vrot.lane.b32.xlu1 %v984_v44, %s3912_s17 }
 0x456   : > { %v3213_v45 = vpop.f32.mrb[10].mxu0 }
 0x457   : > { %v786_v46 = vpop.f32.mrb[11].mxu0 }
 0x4c1   : > { %v998_v49 = vpop.permute.xlu0 %997 }
 0x4c2   : > { %v1002_v50 = vsel %vm596_vm2, %v3213_v45, %v998_v49  ;;  %v996_v51 = vpop.permute.xlu1 %995  ;;  %v1295_v45 = vld [vmem:[%s4522_s6 + $0x30] sm:$0xff]  ;;  %v1204_v49 = vsub.s32 2, %v4048_v25 }
 0x4c3   : > { %v1008_v52 = vadd.f32 %v1006_v48, %v1002_v50  ;;  %v1001_v53 = vsel %vm596_vm2, %v786_v46, %v996_v51  ;;  %v1296_v46 = vld [vmem:[%s4522_s6 + $0x38] sm:$0xff] }
 0x4c4   : > { %v1007_v54 = vadd.f32 %v1006_v48, %v1001_v53  ;;  %v3657_v48 = vpack.c.bf16 %v1296_v46, %v1295_v45  ;;  %v1205_v50 = vrot.slane %v4054_v27, %v1204_v49 }
 0x4c5   : > { %v1010_v56 = vadd.f32 %v1008_v52, %v4065_v34  ;;  %v1195_v34 = vld [vmem:[%s4521_s5 + $0x8] sm:$0xff] }
 0x4c6   : > { %v1009_v55 = vadd.f32 %v1007_v54, %v4059_v31  ;;  %v1194_v31 = vld [vmem:[%s4521_s5] sm:$0xff] }
 0x4c7   : > { %v3629_v63 = vpack.c.bf16 %v1195_v34, %v1194_v31 }
 0x4c8   : > { %3252 = vmatprep.mubr.msk.f32.mxu0 %vm1011_vm6, %v1009_v55 }
 0x4c9   : > { %3253 = vmatmul.mubr.msk.f32.vlgmr.msra.gmra.mrb[12].mxu0 %vm1011_vm6, %v1010_v56  ;;  %3630 = vmatprep.subr.bf16.mxu0 %v3629_v63 }
 0x4ca   : > { %3632 = vmatpush3.bf16.msra.mxu0 %v3629_v63 }
 0x4cb   : > { %3634 = vmatprep.subr.bf16.mxu0 %v3633_v2 }
 0x4ce   : > { %3636 = vmatpush3.bf16.msra.mxu0 %v3633_v2 }
 0x4cf   : > { %3638 = vmatprep.subr.bf16.mxu0 %v3637_v5 }
 0x4d2   : > { %3640 = vmatpush3.bf16.msra.mxu0 %v3637_v5  ;;  %v1566_v5 = vld [vmem:[%s4520_s4] sm:$0xff] }
 0x4d3   : > { %3642 = vmatprep.subr.bf16.mxu0 %v3641_v8  ;;  %v3693_v7 = vpack.c.bf16 %v1567_v6, %v1566_v5 }
 0x4d6   : > { %3644 = vmatpush3.bf16.msra.mxu0 %v3641_v8  ;;  %v1568_v8 = vld [vmem:[%s4520_s4 + $0x10] sm:$0xff] }
 0x4d7   : > { %3662 = vmatprep.subr.bf16.mxu0 %v4116_v32 }
 0x59c   : > { %v3254_v57 = vpop.f32.mrb[12].mxu0 }
 0x59d   : > { %v1094_v58 = vsub.f32 %v1010_v56, %v3254_v57  ;;  %v1084_v59 = vpop.f32.mrb[13].mxu0  ;;  %v1299_v57 = vsub.s32 3, %v4048_v25 }
 0x59e   : > { %v1093_v60 = vsub.f32 %v1009_v55, %v1084_v59 }
 0x59f   : > { %v1096_v62 = vmul.f32 %v1094_v58, %v1094_v58 }
 0x5a0   : > { %v1095_v61 = vmul.f32 %v1093_v60, %v1093_v60 }
 0x5a2   : > { %3271 = vmatprep.mubr.msk.f32.mxu1 %vm1011_vm6, %v1095_v61 }
 0x5a3   : > { %3272 = vmatmul.mubr.msk.f32.vlgmr.msra.gmra.mrb[6].mxu1 %vm1011_vm6, %v1096_v62 }
 0x5a4   : > { %3648 = vmatpush3.bf16.msra.mxu1 %v3645_v12  ;;  %v3701_v12 = vpack.c.bf16 %v1571_v11, %v1570_v10 }
 0x5a5   : > { %3650 = vmatprep.subr.bf16.mxu1 %v3649_v14 }
 0x5a8   : > { %3652 = vmatpush3.bf16.msra.mxu1 %v3649_v14  ;;  %v2887_v14 = vld [vmem:[%s4518_s2 + $0x48] sm:$0xff] }
 0x5a9   : > { %3654 = vmatprep.subr.bf16.mxu1 %v3653_v18 }
 0x5ac   : > { %3656 = vmatpush3.bf16.msra.mxu1 %v3653_v18  ;;  %v2888_v18 = vld [vmem:[%s4518_s2 + $0x50] sm:$0xff] }
 0x5ad   : > { %3658 = vmatprep.subr.bf16.mxu1 %v3657_v48 }
 0x5b0   : > { %3660 = vmatpush3.bf16.msra.mxu1 %v3657_v48 }
 0x5b1   : > { %3678 = vmatprep.subr.bf16.mxu1 %v4116_v32 }
 0x676   : > { %v3273_v19 = vpop.f32.mrb[6].mxu1 }
 0x677   : > { %v1175_v20 = vadd.f32 1e-05, %v3273_v19  ;;  %v1169_v21 = vpop.f32.mrb[7].mxu1  ;;  %v3705_v19 = vpack.c.bf16 %v1573_v17, %v1572_v16 }
 0x678   : > { %v1170_v22 = vadd.f32 1e-05, %v1169_v21  ;;  %v2890_v21 = vld [vmem:[%s4518_s2 + $0x60] sm:$0xff] }
 0x679   : > { %3871 = vrsqrt.f32 %v1175_v20  ;;  %v2889_v20 = vld [vmem:[%s4518_s2 + $0x58] sm:$0xff] }
 0x67a   : > { %3873 = vrsqrt.f32 %v1170_v22  ;;  %v2891_v22 = vld [vmem:[%s4518_s2 + $0x68] sm:$0xff] }
 0x683   : > { %v3872_v29 = vpop.eup %3871 }
 0x684   : > { %v3874_v30 = vpop.eup %3873  ;;  %v1181_v33 = vmul.f32 %v3872_v29, %v1094_v58  ;;  %v1300_v58 = vrot.slane %v4054_v27, %v1299_v57  ;;  %v2893_v29 = vld [vmem:[%s4518_s2 + $0x78] sm:$0xff] }
 0x685   : > { %v1180_v37 = vmul.f32 %v3874_v30, %v1093_v60 }
 0x686   : > { %v1187_v40 = vmul.f32 %v1185_v28, %v1181_v33 }
 0x687   : > { %v1186_v41 = vmul.f32 %v1185_v28, %v1180_v37  ;;  %v2892_v28 = vld [vmem:[%s4518_s2 + $0x70] sm:$0xff] }
 0x688   : > { %v1193_v44 = vadd.f32 %v1191_v38, %v1187_v40  ;;  %v1556_v40 = vsub.s32 6, %v4048_v25 }
 0x689   : > { %v1192_v43 = vadd.f32 %v1191_v38, %v1186_v41  ;;  %v1562_v41 = vsub.s32 7, %v4048_v25 }
 0x68b   : > { %3290 = vmatprep.mubr.msk.f32.mxu0 %vm1011_vm6, %v1192_v43 }
 0x68c   : > { %3291 = vmatmul.mubr.msk.f32.vlgmr.msra.gmra.mrb[14].mxu0 %vm1011_vm6, %v1193_v44 }
 0x68d   : > { %3664 = vmatpush3.bf16.msra.mxu0 %v4116_v32 }
 0x68e   : > { %3666 = vmatprep.subr.bf16.mxu0 %v4121_v35 }
 0x691   : > { %3668 = vmatpush3.bf16.msra.mxu0 %v4121_v35 }
 0x692   : > { %3670 = vmatprep.subr.bf16.mxu0 %v4137_v39 }
 0x695   : > { %3672 = vmatpush3.bf16.msra.mxu0 %v4137_v39 }
 0x696   : > { %3674 = vmatprep.subr.bf16.mxu0 %v4149_v42 }
 0x699   : > { %3676 = vmatpush3.bf16.msra.mxu0 %v4149_v42 }
 0x69a   : > { %3694 = vmatprep.subr.bf16.mxu0 %v3693_v7 }
 0x75f   : > { %v3292_v51 = vpop.f32.mrb[14].mxu0 }
 0x760   : > { %v1284_v52 = vadd.f32 %v3292_v51, %v1205_v50  ;;  %v1278_v53 = vpop.f32.mrb[15].mxu0 }
 0x761   : > { %v1279_v54 = vadd.f32 %v1278_v53, %v1205_v50  ;;  %v1563_v50 = vrot.slane %v4054_v27, %v1562_v41 }
 0x762   : > { %v1288_v56 = vmax.f32 %v1284_v52, 0.0 }
 0x763   : > { %v1287_v55 = vmax.f32 %v1279_v54, 0.0 }
 0x765   : > { %3309 = vmatprep.mubr.msk.f32.mxu1 %vm1011_vm6, %v1287_v55 }
 0x766   : > { %3310 = vmatmul.mubr.msk.f32.vlgmr.msra.gmra.mrb[8].mxu1 %vm1011_vm6, %v1288_v56 }
 0x767   : > { %3680 = vmatpush3.bf16.msra.mxu1 %v4116_v32 }
 0x768   : > { %3682 = vmatprep.subr.bf16.mxu1 %v4121_v35 }
 0x76b   : > { %3684 = vmatpush3.bf16.msra.mxu1 %v4121_v35 }
 0x76c   : > { %3686 = vmatprep.subr.bf16.mxu1 %v4137_v39 }
 0x76f   : > { %3688 = vmatpush3.bf16.msra.mxu1 %v4137_v39 }
 0x770   : > { %3690 = vmatprep.subr.bf16.mxu1 %v4149_v42 }
 0x773   : > { %3692 = vmatpush3.bf16.msra.mxu1 %v4149_v42 }
 0x774   : > { %3369 = vmatprep.subr.mxu1 %v4011_v15 }
 0x839   : > { %v3311_v59 = vpop.f32.mrb[8].mxu1 }
 0x83a   : > { %v1379_v60 = vadd.f32 %v3311_v59, %v1300_v58  ;;  %v1373_v61 = vpop.f32.mrb[9].mxu1 }
 0x83b   : > { %v1374_v62 = vadd.f32 %v1373_v61, %v1300_v58 }
 0x83c   : > { %v1383_v34 = vadd.f32 %v1379_v60, %v1193_v44 }
 0x83d   : > { %v1382_v31 = vadd.f32 %v1374_v62, %v1192_v43  ;;  %v1557_v43 = vrot.slane %v4054_v27, %v1556_v40 }
 0x83f   : > { %3328 = vmatprep.mubr.msk.f32.mxu0 %vm1011_vm6, %v1382_v31 }
 0x840   : > { %3329 = vmatmul.mubr.msk.f32.vlgmr.msra.gmra.mrb[16].mxu0 %vm1011_vm6, %v1383_v34 }
 0x841   : > { %3696 = vmatpush3.bf16.msra.mxu0 %v3693_v7 }
 0x913   : > { %v3330_v63 = vpop.f32.mrb[16].mxu0 }
 0x914   : > { %v1466_v0 = vsub.f32 %v1383_v34, %v3330_v63  ;;  %v1456_v1 = vpop.f32.mrb[17].mxu0 }
 0x915   : > { %v1465_v2 = vsub.f32 %v1382_v31, %v1456_v1  ;;  %v4344_v1 = vld [vmem:[%s4523_s7 + $0x8] sm:$0xff] }
 0x916   : > { %v1468_v4 = vmul.f32 %v1466_v0, %v1466_v0 }
 0x917   : > { %v1467_v3 = vmul.f32 %v1465_v2, %v1465_v2 }
 0x919   : > { %3347 = vmatprep.mubr.msk.f32.mxu1 %vm1011_vm6, %v1467_v3 }
 0x91a   : > { %3348 = vmatmul.mubr.msk.f32.vlgmr.msra.gmra.mrb[10].mxu1 %vm1011_vm6, %v1468_v4 }
 0x91b   : > { %3370 = vmatpush3.msra.mxu1 %v4011_v15  ;;  %v3697_v15 = vpack.c.bf16 %v1569_v9, %v1568_v8  ;;  %3371 = vmatprep.mubr.msk.f32.mxu1 %vm466_vm1, %v2886_v13 }
 0x91d   : > { %3698 = vmatprep.subr.bf16.mxu0 %v3697_v15 }
 0x91e   : > { %3700 = vmatpush3.bf16.msra.mxu0 %v3697_v15  ;;  %3372 = vmatmul.mubr.msk.f32.vlgmr.msra.gmra.mrb[12].mxu1 %vm466_vm1, %v2887_v14 }
 0x91f   : > { %3702 = vmatprep.subr.bf16.mxu0 %v3701_v12  ;;  %3374 = vmatprep.mubr.msk.f32.mxu1 %vm466_vm1, %v2888_v18 }
 0x922   : > { %3704 = vmatpush3.bf16.msra.mxu0 %v3701_v12  ;;  %3375 = vmatmul.mubr.msk.f32.gmra.mrb[14].mxu1 %vm466_vm1, %v2889_v20 }
 0x923   : > { %3706 = vmatprep.subr.bf16.mxu0 %v3705_v19  ;;  %3377 = vmatprep.mubr.msk.f32.mxu1 %vm466_vm1, %v2890_v21 }
 0x926   : > { %3708 = vmatpush3.bf16.msra.mxu0 %v3705_v19  ;;  %3378 = vmatmul.mubr.msk.f32.gmra.mrb[16].mxu1 %vm466_vm1, %v2891_v22 }
 0x927   : > { %3380 = vmatprep.mubr.msk.f32.mxu1 %vm466_vm1, %v2892_v28 }
 0x92a   : > { %3381 = vmatmul.mubr.msk.f32.gmra.mrb[18].mxu1 %vm466_vm1, %v2893_v29 }
 0x9ed   : > { %v3349_v30 = vpop.f32.mrb[10].mxu1 }
 0x9ee   : > { %v1547_v33 = vadd.f32 1e-05, %v3349_v30  ;;  %v1541_v37 = vpop.f32.mrb[11].mxu1 }
 0x9ef   : > { %v1542_v38 = vadd.f32 1e-05, %v1541_v37 }
 0x9f0   : > { %3875 = vrsqrt.f32 %v1547_v33 }
 0x9f1   : > { %3877 = vrsqrt.f32 %v1542_v38  ;;  %v3373_v55 = vpop.f32.mrb[12].mxu1 }
 0x9f2   : > { %v1758_v56 = vpop.f32.mrb[13].mxu1 }
 0x9f3   : > { %v3709_v58 = vpack.c.bf16 %v3373_v55, %v1758_v56 }
 0x9f5   : > { %v3376_v59 = vpop.f32.mrb[14].mxu1  ;;  %3710 = vmatprep.subr.bf16.mxu0 %v3709_v58  ;;  %3719 = vmatprep.subr.msk.bf16.mxu1 %vm4069_vm4, %v3709_v58 }
 0x9f6   : > { %v1768_v60 = vpop.f32.mrb[15].mxu1  ;;  %3722 = vmatpush3.bf16.xpose.msk.msra.mxu1 %vm4069_vm4, %v3709_v58 }
 0x9f7   : > { %v3713_v27 = vpack.c.bf16 %v3376_v59, %v1768_v60 }
 0x9f9   : > { %3725 = vmatprep.subr.msk.bf16.mxu1 %vm4069_vm4, %v3713_v27  ;;  %v3379_v61 = vpop.f32.mrb[16].mxu1 }
 0x9fa   : > { %v3876_v44 = vpop.eup %3875  ;;  %v1778_v62 = vpop.f32.mrb[17].mxu1 }
 0x9fb   : > { %v3878_v45 = vpop.eup %3877  ;;  %v1553_v46 = vmul.f32 %v3876_v44, %v1466_v0  ;;  %v4333_v31 = vpack.c.bf16 %v3379_v61, %v1778_v62 }
 0x9fc   : > { %v1552_v48 = vmul.f32 %v3878_v45, %v1465_v2  ;;  %v1577_v2 = vrot.slane %v4344_v1, %v374_v26 }
 0x9fd   : > { %v1559_v51 = vmul.f32 %v1557_v43, %v1553_v46  ;;  %v3382_v34 = vpop.f32.mrb[18].mxu1 }
 0x9fe   : > { %v1558_v52 = vmul.f32 %v1557_v43, %v1552_v48  ;;  %3728 = vmatpush3.bf16.xpose.msk.msra.mxu1 %vm4069_vm4, %v3713_v27  ;;  %v1788_v63 = vpop.f32.mrb[19].mxu1 }
 0x9ff   : > { %v1565_v54 = vadd.f32 %v1563_v50, %v1559_v51  ;;  %v4336_v0 = vpack.c.bf16 %v3382_v34, %v1788_v63  ;;  %3739 = vmatprep.subr.msk.bf16.mxu1 %vm4069_vm4, %v4333_v31 }
 0xa00   : > { %v1564_v53 = vadd.f32 %v1563_v50, %v1558_v52 }
 0xa02   : > { %3366 = vmatprep.mubr.msk.f32.mxu0 %vm1011_vm6, %v1564_v53 }
 0xa03   : > { %3367 = vmatmul.mubr.msk.f32.vlgmr.msra.gmra.mrb[18].mxu0 %vm1011_vm6, %v1565_v54 }
 0xa04   : > { %3712 = vmatpush3.bf16.msra.mxu0 %v3709_v58 }
 0xa05   : > { %3714 = vmatprep.subr.bf16.mxu0 %v3713_v27 }
 0xa08   : > { %3716 = vmatpush3.bf16.msra.mxu0 %v3713_v27 }
 0xa09   : > { %3730 = vmatprep.subr.bf16.mxu0 %v4333_v31 }
 0xad6   : > { %v3368_v3 = vpop.f32.mrb[18].mxu0 }
 0xad7   : > { %v1650_v4 = vpop.f32.mrb[19].mxu0  ;;  %v4351_v6 = vadd.f32 %v3368_v3, %v1577_v2 }
 0xad8   : > { %v4349_v5 = vadd.f32 %v1650_v4, %v1577_v2  ;;  %v2204_v2 = vrot.slane %v4344_v1, %v1005_v47 }
 0xada   : > { %1993 = vrot.lane.b32.xlu1 %v4349_v5, %s3911_s18  ;;  %3391 = vmatprep.mubr.msk.f32.mxu0 %vm596_vm2, %v4349_v5 }
 0xadb   : > { %3392 = vmatmul.mubr.msk.f32.vlgmr.msra.gmra.mrb[20].mxu0 %vm596_vm2, %v4351_v6 }
 0xadc   : > { %3732 = vmatpush3.bf16.msra.mxu0 %v4333_v31 }
 0xadd   : > { %3734 = vmatprep.subr.bf16.mxu0 %v4336_v0 }
 0xade   : > { %1995 = vrot.lane.b32.xlu1 %v4351_v6, %s3911_s18 }
 0xae0   : > { %3736 = vmatpush3.bf16.msra.mxu0 %v4336_v0 }
 0xae1   : > { %3750 = vmatprep.subr.bf16.mxu0 %v4116_v32 }
 0xb4c   : > { %v1994_v26 = vpop.permute.xlu1 %1993 }
 0xb4d   : > { %3413 = vmatprep.mubr.msk.f32.mxu0 %vm596_vm2, %v1994_v26 }
 0xb50   : > { %v1996_v7 = vpop.permute.xlu1 %1995 }
 0xb51   : > { %3414 = vmatmul.mubr.msk.f32.vlgmr.msra.gmra.mrb[22].mxu0 %vm596_vm2, %v1996_v7 }
 0xb52   : > { %3752 = vmatpush3.bf16.msra.mxu0 %v4116_v32 }
 0xb53   : > { %3754 = vmatprep.subr.bf16.mxu0 %v4121_v35 }
 0xb56   : > { %3756 = vmatpush3.bf16.msra.mxu0 %v4121_v35 }
 0xb57   : > { %3758 = vmatprep.subr.bf16.mxu0 %v4137_v39 }
 0xb5a   : > { %3760 = vmatpush3.bf16.msra.mxu0 %v4137_v39 }
 0xb5b   : > { %3762 = vmatprep.subr.bf16.mxu0 %v4149_v42 }
 0xb5e   : > { %3764 = vmatpush3.bf16.msra.mxu0 %v4149_v42 }
 0xbae   : > { %v3393_v8 = vpop.f32.mrb[20].mxu0 }
 0xbaf   : > { %v1869_v9 = vpop.f32.mrb[21].mxu0  ;;  %v1881_v15 = vsel %vm682_vm5, %v3393_v8, -inf }
 0xbb0   : > { %1882 = vmax.xlane.f32.xlu0 %v1881_v15  ;;  %v1878_v10 = vsel %vm678_vm3, %v1869_v9, -inf }
 0xbb1   : > { %1879 = vmax.xlane.f32.xlu1 %v1878_v10 }
 0xc24   : > { %v3415_v11 = vpop.f32.mrb[22].mxu0 }
 0xc25   : > { %v2067_v12 = vpop.f32.mrb[23].mxu0  ;;  %v2079_v13 = vsel %vm682_vm5, %v3415_v11, -inf }
 0xc26   : > { %2080 = vmax.xlane.f32.xlu0 %v2079_v13  ;;  %v2076_v14 = vsel %vm678_vm3, %v2067_v12, -inf }
 0xc27   : > { %2077 = vmax.xlane.f32.xlu1 %v2076_v14 }
 0xc3d   : > { %v1883_v16 = vpop.xlane.xlu0 %1882 }
 0xc3e   : > { %v1885_v17 = vsub.f32 %v3393_v8, %v1883_v16  ;;  %v1880_v18 = vpop.xlane.xlu1 %1879 }
 0xc3f   : > { %v1884_v19 = vsub.f32 %v1869_v9, %v1880_v18  ;;  %v2924_v18 = vld [vmem:[%s4521_s5 + $0x50] sm:$0xff] }
 0xc40   : > { %v1888_v20 = vmul.f32 1.442695, %v1885_v17 }
 0xc41   : > { %v1886_v21 = vmul.f32 1.442695, %v1884_v19  ;;  %v2925_v19 = vld [vmem:[%s4521_s5 + $0x58] sm:$0xff] }
 0xc42   : > { %3879 = vpow2.f32 %v1888_v20  ;;  %v3785_v20 = vpack.c.bf16 %v2925_v19, %v2924_v18 }
 0xc43   : > { %3881 = vpow2.f32 %v1886_v21  ;;  %v2926_v21 = vld [vmem:[%s4521_s5 + $0x60] sm:$0xff] }
 0xc4c   : > { %v3880_v22 = vpop.eup %3879 }
 0xc4d   : > { %v3882_v28 = vpop.eup %3881  ;;  %v1893_v29 = vsel %vm682_vm5, %v3880_v22, 0.0 }
 0xc4e   : > { %1894 = vadd.xlane.f32.xlu0 %v1893_v29  ;;  %v1890_v30 = vsel %vm678_vm3, %v3882_v28, 0.0  ;;  %v2928_v29 = vld [vmem:[%s4521_s5 + $0x70] sm:$0xff] }
 0xc4f   : > { %1891 = vadd.xlane.f32.xlu1 %v1890_v30  ;;  %v2929_v30 = vld [vmem:[%s4521_s5 + $0x78] sm:$0xff] }
 0xcb3   : > { %v2081_v33 = vpop.xlane.xlu0 %2080 }
 0xcb4   : > { %v2083_v37 = vsub.f32 %v3415_v11, %v2081_v33  ;;  %v2078_v38 = vpop.xlane.xlu1 %2077  ;;  %v3793_v33 = vpack.c.bf16 %v2929_v30, %v2928_v29 }
 0xcb5   : > { %v2082_v43 = vsub.f32 %v2067_v12, %v2078_v38  ;;  %v2933_v38 = vld [vmem:[%s4522_s6 + $0x48] sm:$0xff] }
 0xcb6   : > { %v2086_v44 = vmul.f32 1.442695, %v2083_v37  ;;  %v2932_v37 = vld [vmem:[%s4522_s6 + $0x40] sm:$0xff] }
 0xcb7   : > { %v2084_v45 = vmul.f32 1.442695, %v2082_v43  ;;  %v2934_v43 = vld [vmem:[%s4522_s6 + $0x50] sm:$0xff] }
 0xcb8   : > { %3883 = vpow2.f32 %v2086_v44  ;;  %v3797_v44 = vpack.c.bf16 %v2933_v38, %v2932_v37 }
 0xcb9   : > { %3885 = vpow2.f32 %v2084_v45  ;;  %v2935_v45 = vld [vmem:[%s4522_s6 + $0x58] sm:$0xff] }
 0xcc2   : > { %v3884_v46 = vpop.eup %3883 }
 0xcc3   : > { %v3886_v48 = vpop.eup %3885  ;;  %v2091_v50 = vsel %vm682_vm5, %v3884_v46, 0.0 }
 0xcc4   : > { %2092 = vadd.xlane.f32.xlu0 %v2091_v50  ;;  %v2088_v51 = vsel %vm678_vm3, %v3886_v48, 0.0  ;;  %v2937_v50 = vld [vmem:[%s4522_s6 + $0x68] sm:$0xff] }
 0xcc5   : > { %2089 = vadd.xlane.f32.xlu1 %v2088_v51 }
 0xcdb   : > { %v1895_v52 = vpop.xlane.xlu0 %1894 }
 0xcdc   : > { %3887 = vrcp.f32 %v1895_v52  ;;  %v1892_v53 = vpop.xlane.xlu1 %1891 }
 0xcdd   : > { %3889 = vrcp.f32 %v1892_v53 }
 0xce6   : > { %v3888_v54 = vpop.eup %3887 }
 0xce7   : > { %v3890_v55 = vpop.eup %3889  ;;  %v1899_v58 = vmul.f32 %v3888_v54, %v3880_v22  ;;  %v2927_v22 = vld [vmem:[%s4521_s5 + $0x68] sm:$0xff] }
 0xce8   : > { %v1898_v56 = vmul.f32 %v3890_v55, %v3882_v28  ;;  %v3789_v28 = vpack.c.bf16 %v2927_v22, %v2926_v21 }
 0xcea   : > { %3402 = vmatprep.mubr.msk.f32.mxu1 %vm678_vm3, %v1898_v56  ;;  %v2382_v56 = vrot.slane %v4344_v1, %v1184_v23  ;;  %v2938_v23 = vld [vmem:[%s4522_s6 + $0x70] sm:$0xff] }
 0xceb   : > { %3403 = vmatmul.mubr.msk.f32.vlgmr.msra.gmra.mrb[20].mxu1 %vm678_vm3, %v1899_v58 }
 0xcec   : > { %3742 = vmatpush3.bf16.xpose.msk.msra.mxu1 %vm4069_vm4, %v4333_v31 }
 0xced   : > { %3745 = vmatprep.subr.msk.bf16.mxu1 %vm4069_vm4, %v4336_v0 }
 0xcf4   : > { %3748 = vmatpush3.bf16.xpose.msk.msra.mxu1 %vm4069_vm4, %v4336_v0 }
 0xcf5   : > { %3766 = vmatprep.subr.bf16.mxu1 %v4116_v32 }
 0xd51   : > { %v2093_v59 = vpop.xlane.xlu0 %2092 }
 0xd52   : > { %3891 = vrcp.f32 %v2093_v59  ;;  %v2090_v60 = vpop.xlane.xlu1 %2089 }
 0xd53   : > { %3893 = vrcp.f32 %v2090_v60 }
 0xd5c   : > { %v3892_v27 = vpop.eup %3891 }
 0xd5d   : > { %v3894_v61 = vpop.eup %3893  ;;  %v2097_v34 = vmul.f32 %v3892_v27, %v3884_v46  ;;  %v3801_v46 = vpack.c.bf16 %v2935_v45, %v2934_v43 }
 0xd5e   : > { %v2096_v62 = vmul.f32 %v3894_v61, %v3886_v48  ;;  %v2936_v48 = vld [vmem:[%s4522_s6 + $0x60] sm:$0xff]  ;;  %v2388_v61 = vrot.slane %v4344_v1, %v1190_v24  ;;  %v2939_v24 = vld [vmem:[%s4522_s6 + $0x78] sm:$0xff] }
 0xd5f   : > { %v3805_v51 = vpack.c.bf16 %v2937_v50, %v2936_v48 }
 0xd60   : > { %3424 = vmatprep.mubr.msk.f32.mxu1 %vm678_vm3, %v2096_v62 }
 0xd61   : > { %3425 = vmatmul.mubr.msk.f32.vlgmr.msra.gmra.mrb[22].mxu1 %vm678_vm3, %v2097_v34 }
 0xd62   : > { %3768 = vmatpush3.bf16.msra.mxu1 %v4116_v32 }
 0xd63   : > { %3770 = vmatprep.subr.bf16.mxu1 %v4121_v35 }
 0xd66   : > { %3772 = vmatpush3.bf16.msra.mxu1 %v4121_v35 }
 0xd67   : > { %3774 = vmatprep.subr.bf16.mxu1 %v4137_v39 }
 0xd6a   : > { %3776 = vmatpush3.bf16.msra.mxu1 %v4137_v39 }
 0xd6b   : > { %3778 = vmatprep.subr.bf16.mxu1 %v4149_v42 }
 0xd6e   : > { %3780 = vmatpush3.bf16.msra.mxu1 %v4149_v42 }
 0xd6f   : > { %3798 = vmatprep.subr.bf16.mxu1 %v3797_v44 }
 0xdbe   : > { %v3404_v36 = vpop.f32.mrb[20].mxu1 }
 0xdbf   : > { %v1984_v31 = vpop.f32.mrb[21].mxu1 }
 0xe34   : > { %v3426_v63 = vpop.f32.mrb[22].mxu1 }
 0xe35   : > { %2195 = vrot.lane.b32.xlu0 %v3426_v63, %s3912_s17  ;;  %v2182_v0 = vpop.f32.mrb[23].mxu1  ;;  %v3809_v63 = vpack.c.bf16 %v2939_v24, %v2938_v23 }
 0xe36   : > { %2193 = vrot.lane.b32.xlu1 %v2182_v0, %s3912_s17  ;;  %v2403_v0 = vrot.slane %v4344_v1, %v1204_v49  ;;  %v2499_v49 = vrot.slane %v4344_v1, %v1299_v57 }
 0xea7   : > { %v2196_v3 = vpop.permute.xlu0 %2195 }
 0xea8   : > { %v2200_v4 = vsel %vm596_vm2, %v3404_v36, %v2196_v3  ;;  %v2194_v26 = vpop.permute.xlu1 %2193 }
 0xea9   : > { %v2206_v7 = vadd.f32 %v2204_v2, %v2200_v4  ;;  %v2199_v8 = vsel %vm596_vm2, %v1984_v31, %v2194_v26 }
 0xeaa   : > { %v2205_v9 = vadd.f32 %v2204_v2, %v2199_v8 }
 0xeab   : > { %v2208_v10 = vadd.f32 %v2206_v7, %v4351_v6  ;;  %v2923_v6 = vld [vmem:[%s4521_s5 + $0x48] sm:$0xff] }
 0xeac   : > { %v2207_v15 = vadd.f32 %v2205_v9, %v4349_v5  ;;  %v2922_v5 = vld [vmem:[%s4521_s5 + $0x40] sm:$0xff] }
 0xead   : > { %v3781_v17 = vpack.c.bf16 %v2923_v6, %v2922_v5 }
 0xeae   : > { %3443 = vmatprep.mubr.msk.f32.mxu0 %vm1011_vm6, %v2207_v15 }
 0xeaf   : > { %3444 = vmatmul.mubr.msk.f32.vlgmr.msra.gmra.mrb[24].mxu0 %vm1011_vm6, %v2208_v10  ;;  %3782 = vmatprep.subr.bf16.mxu0 %v3781_v17 }
 0xeb0   : > { %3784 = vmatpush3.bf16.msra.mxu0 %v3781_v17  ;;  %v2756_v17 = vrot.slane %v4344_v1, %v1556_v40 }
 0xeb1   : > { %3786 = vmatprep.subr.bf16.mxu0 %v3785_v20 }
 0xeb4   : > { %3788 = vmatpush3.bf16.msra.mxu0 %v3785_v20  ;;  %v2762_v20 = vrot.slane %v4344_v1, %v1562_v41 }
 0xeb5   : > { %3790 = vmatprep.subr.bf16.mxu0 %v3789_v28 }
 0xeb8   : > { %3792 = vmatpush3.bf16.msra.mxu0 %v3789_v28 }
 0xeb9   : > { %3794 = vmatprep.subr.bf16.mxu0 %v3793_v33 }
 0xebc   : > { %3796 = vmatpush3.bf16.msra.mxu0 %v3793_v33 }
 0xebd   : > { %3814 = vmatprep.subr.bf16.mxu0 %v4116_v32 }
 0xf82   : > { %v3445_v11 = vpop.f32.mrb[24].mxu0 }
 0xf83   : > { %v2291_v12 = vsub.f32 %v2208_v10, %v3445_v11  ;;  %v2281_v13 = vpop.f32.mrb[25].mxu0 }
 0xf84   : > { %v2290_v47 = vsub.f32 %v2207_v15, %v2281_v13 }
 0xf85   : > { %v2293_v16 = vmul.f32 %v2291_v12, %v2291_v12 }
 0xf86   : > { %v2292_v14 = vmul.f32 %v2290_v47, %v2290_v47 }
 0xf88   : > { %3462 = vmatprep.mubr.msk.f32.mxu1 %vm1011_vm6, %v2292_v14 }
 0xf89   : > { %3463 = vmatmul.mubr.msk.f32.vlgmr.msra.gmra.mrb[24].mxu1 %vm1011_vm6, %v2293_v16 }
 0xf8a   : > { %3800 = vmatpush3.bf16.msra.mxu1 %v3797_v44 }
 0xf8b   : > { %3802 = vmatprep.subr.bf16.mxu1 %v3801_v46 }
 0xf8e   : > { %3804 = vmatpush3.bf16.msra.mxu1 %v3801_v46 }
 0xf8f   : > { %3806 = vmatprep.subr.bf16.mxu1 %v3805_v51 }
 0xf92   : > { %3808 = vmatpush3.bf16.msra.mxu1 %v3805_v51 }
 0xf93   : > { %3810 = vmatprep.subr.bf16.mxu1 %v3809_v63 }
 0xf96   : > { %3812 = vmatpush3.bf16.msra.mxu1 %v3809_v63 }
 0xf97   : > { %3830 = vmatprep.subr.bf16.mxu1 %v4116_v32 }
0x105c   : > { %v3464_v52 = vpop.f32.mrb[24].mxu1 }
0x105d   : > { %v2372_v53 = vadd.f32 1e-05, %v3464_v52  ;;  %v2366_v54 = vpop.f32.mrb[25].mxu1 }
0x105e   : > { %v2367_v55 = vadd.f32 1e-05, %v2366_v54 }
0x105f   : > { %3895 = vrsqrt.f32 %v2372_v53 }
0x1060   : > { %3897 = vrsqrt.f32 %v2367_v55 }
0x1069   : > { %v3896_v58 = vpop.eup %3895 }
0x106a   : > { %v3898_v59 = vpop.eup %3897  ;;  %v2378_v60 = vmul.f32 %v3896_v58, %v2291_v12 }
0x106b   : > { %v2377_v27 = vmul.f32 %v3898_v59, %v2290_v47 }
0x106c   : > { %v2384_v62 = vmul.f32 %v2382_v56, %v2378_v60 }
0x106d   : > { %v2383_v34 = vmul.f32 %v2382_v56, %v2377_v27 }
0x106e   : > { %v2390_v31 = vadd.f32 %v2388_v61, %v2384_v62 }
0x106f   : > { %v2389_v36 = vadd.f32 %v2388_v61, %v2383_v34 }
0x1071   : > { %3481 = vmatprep.mubr.msk.f32.mxu0 %vm1011_vm6, %v2389_v36 }
0x1072   : > { %3482 = vmatmul.mubr.msk.f32.vlgmr.msra.gmra.mrb[26].mxu0 %vm1011_vm6, %v2390_v31 }
0x1073   : > { %3816 = vmatpush3.bf16.msra.mxu0 %v4116_v32 }
0x1074   : > { %3818 = vmatprep.subr.bf16.mxu0 %v4121_v35 }
0x1077   : > { %3820 = vmatpush3.bf16.msra.mxu0 %v4121_v35 }
0x1078   : > { %3822 = vmatprep.subr.bf16.mxu0 %v4137_v39 }
0x107b   : > { %3824 = vmatpush3.bf16.msra.mxu0 %v4137_v39 }
0x107c   : > { %3826 = vmatprep.subr.bf16.mxu0 %v4149_v42 }
0x107f   : > { %3828 = vmatpush3.bf16.msra.mxu0 %v4149_v42 }
0x1145   : > { %v3483_v2 = vpop.f32.mrb[26].mxu0 }
0x1146   : > { %v2482_v3 = vadd.f32 %v3483_v2, %v2403_v0  ;;  %v2476_v4 = vpop.f32.mrb[27].mxu0 }
0x1147   : > { %v2477_v26 = vadd.f32 %v2476_v4, %v2403_v0 }
0x1148   : > { %v2486_v8 = vmax.f32 %v2482_v3, 0.0 }
0x1149   : > { %v2485_v7 = vmax.f32 %v2477_v26, 0.0 }
0x114b   : > { %3500 = vmatprep.mubr.msk.f32.mxu1 %vm1011_vm6, %v2485_v7 }
0x114c   : > { %3501 = vmatmul.mubr.msk.f32.vlgmr.msra.gmra.mrb[26].mxu1 %vm1011_vm6, %v2486_v8 }
0x114d   : > { %3832 = vmatpush3.bf16.msra.mxu1 %v4116_v32 }
0x114e   : > { %3834 = vmatprep.subr.bf16.mxu1 %v4121_v35 }
0x1151   : > { %3836 = vmatpush3.bf16.msra.mxu1 %v4121_v35 }
0x1152   : > { %3838 = vmatprep.subr.bf16.mxu1 %v4137_v39 }
0x1155   : > { %3840 = vmatpush3.bf16.msra.mxu1 %v4137_v39 }
0x1156   : > { %3842 = vmatprep.subr.bf16.mxu1 %v4149_v42 }
0x1159   : > { %3844 = vmatpush3.bf16.msra.mxu1 %v4149_v42 }
0x121f   : > { %v3502_v9 = vpop.f32.mrb[26].mxu1 }
0x1220   : > { %v2578_v15 = vadd.f32 %v3502_v9, %v2499_v49  ;;  %v2572_v10 = vpop.f32.mrb[27].mxu1 }
0x1221   : > { %v2573_v32 = vadd.f32 %v2572_v10, %v2499_v49 }
0x1222   : > { %v2582_v12 = vadd.f32 %v2578_v15, %v2390_v31 }
0x1223   : > { %v2581_v11 = vadd.f32 %v2573_v32, %v2389_v36 }
0x1225   : > { %3519 = vmatprep.mubr.msk.f32.mxu0 %vm1011_vm6, %v2581_v11 }
0x1226   : > { %3520 = vmatmul.mubr.msk.f32.vlgmr.msra.gmra.mrb[28].mxu0 %vm1011_vm6, %v2582_v12 }
0x12f9   : > { %v3521_v35 = vpop.f32.mrb[28].mxu0 }
0x12fa   : > { %v2665_v39 = vsub.f32 %v2582_v12, %v3521_v35  ;;  %v2655_v13 = vpop.f32.mrb[29].mxu0 }
0x12fb   : > { %v2664_v47 = vsub.f32 %v2581_v11, %v2655_v13 }
0x12fc   : > { %v2667_v42 = vmul.f32 %v2665_v39, %v2665_v39 }
0x12fd   : > { %v2666_v14 = vmul.f32 %v2664_v47, %v2664_v47 }
0x12ff   : > { %3538 = vmatprep.mubr.msk.f32.mxu1 %vm1011_vm6, %v2666_v14 }
0x1300   : > { %3539 = vmatmul.mubr.msk.f32.vlgmr.msra.gmra.mrb[28].mxu1 %vm1011_vm6, %v2667_v42 }
0x13d3   : > { %v3540_v57 = vpop.f32.mrb[28].mxu1 }
0x13d4   : > { %v2746_v16 = vadd.f32 1e-05, %v3540_v57  ;;  %v2740_v5 = vpop.f32.mrb[29].mxu1 }
0x13d5   : > { %v2741_v6 = vadd.f32 1e-05, %v2740_v5 }
0x13d6   : > { %3899 = vrsqrt.f32 %v2746_v16 }
0x13d7   : > { %3901 = vrsqrt.f32 %v2741_v6 }
0x13e0   : > { %v3900_v18 = vpop.eup %3899 }
0x13e1   : > { %v3902_v19 = vpop.eup %3901  ;;  %v2752_v21 = vmul.f32 %v3900_v18, %v2665_v39 }
0x13e2   : > { %v2751_v22 = vmul.f32 %v3902_v19, %v2664_v47 }
0x13e3   : > { %v2758_v28 = vmul.f32 %v2756_v17, %v2752_v21 }
0x13e4   : > { %v2757_v29 = vmul.f32 %v2756_v17, %v2751_v22 }
0x13e5   : > { %v2764_v30 = vadd.f32 %v2762_v20, %v2758_v28 }
0x13e6   : > { %v2763_v33 = vadd.f32 %v2762_v20, %v2757_v29 }
0x13e7   : > { %v2766_v37 = vsel %vm1011_vm6, %v2764_v30, 0.0 }
0x13e8   : > { %2768 = vst [vmem:[%s349_s19 + $0x8] sm:$0xf] %v2766_v37  ;;  %v2765_v40 = vsel %vm1011_vm6, %v2763_v33, 0.0 }
0x13e9   : > { %2767 = vst [vmem:[%s349_s19] sm:$0xff] %v2765_v40 }
0x13ea PF: > { %s19_s30 = sadd.s32 1, %s3909_s30  }
0x13eb   : > { %p16_p4 = scmp.ge.s32.totalorder %s19_s30, 4  }
0x13ed   :  { %18 = sbr.rel (!%p16_p4) target bundleno = 1 (0x1), region = 92 }

</bundles_post_ra>
